<compile_context>
chip_gen: v7x
topology: tpu7x:2x2x1
jax: 0.10.0
libtpu: 0.0.40
codegen_flags: <defaults>
</compile_context>

<pallas_src>
import functools
import math

import jax
import jax.numpy as jnp
from jax.experimental import pallas as pl
from jax.experimental.pallas import tpu as pltpu


_LANE_TILE = 512                          # lane-dense (multiple of 128) -> unmasked full-width stores
_TILE_BYTE_BUDGET = 4 * 1024 * 1024       # in+out bytes per tile; x2 (double-buffered) = 8 MiB
_VMEM_LIMIT_BYTES = 32 * 1024 * 1024      # explicit scoped-VMEM limit (safe on v5e/v6e/v7x)
_MIN_KERNEL_ELEMENTS = 1 << 18            # below this, plain fn beats kernel dispatch overhead


def _round_up(x, m):
    return ((x + m - 1) // m) * m


def _lambda_kernel(x_ref, o_ref, *, fn):
    # User-supplied elementwise fn runs on the VPU/EUP over the current VMEM tile.
    o_ref[...] = fn(x_ref[...]).astype(o_ref.dtype)


class PallasLambda:
    """Pallas analogue of mdistiller Lambda: applies `fn` inside a TPU kernel.

    Contract for the kernelized path: `fn` must be a strictly per-element
    (elementwise, shape-preserving) jnp function of a single array argument.
    Anything else falls back to calling `fn` directly.
    """

    def __init__(self, fn, min_kernel_elements=_MIN_KERNEL_ELEMENTS):
        self.fn = fn
        self.min_kernel_elements = min_kernel_elements

    def __call__(self, *args, **kwargs):
        # TODO(synk): Lambda.forward accepts arbitrary *args/**kwargs and arbitrary
        # fns (reshapes, reductions, softmax, ...); only the single-array
        # elementwise hot path is kernelized, the rest uses plain fn.
        if kwargs or len(args) != 1 or not isinstance(args[0], jax.Array):
            return self.fn(*args, **kwargs)
        x = args[0]

        orig_shape = x.shape
        total = math.prod(orig_shape)  # pure-Python shape math (no device consts)
        if total == 0 or total < self.min_kernel_elements:
            return self.fn(x)

        # Derive output dtype/shape from fn itself (dtype-promoting fns keep
        # their promoted dtype; shape-changing fns fall back to plain fn).
        out_struct = jax.eval_shape(self.fn, jax.ShapeDtypeStruct(x.shape, x.dtype))
        if out_struct.shape != orig_shape:
            return self.fn(x)
        # TODO(synk): shape-preserving but non-elementwise fns (e.g. softmax along
        # an axis) cannot be detected here; they would be silently wrong on the
        # flattened slab, so the documented contract is "fn must be per-element".
        out_dtype = out_struct.dtype

        in_item = jnp.dtype(x.dtype).itemsize
        out_item = jnp.dtype(out_dtype).itemsize
        # Sublane packing multiple for BOTH dtypes: 8 (4B), 16 (2B), 32 (1B).
        sub_mult = max(8, 32 // in_item, 32 // out_item)

        # Largest dtype-aligned row tile with input+output under the byte budget.
        tr_max = max(
            sub_mult,
            (_TILE_BYTE_BUDGET // (_LANE_TILE * (in_item + out_item)))
            // sub_mult * sub_mult,
        )

        rows = pl.cdiv(total, _LANE_TILE)
        # Keep >= 2 grid steps whenever possible so ("parallel",) can shard the
        # grid across v7x's two TensorCores; Pallas masks the ragged last tile.
        if rows > 2 * sub_mult:
            tile_rows = min(tr_max, _round_up(pl.cdiv(rows, 2), sub_mult))
        else:
            tile_rows = min(tr_max, _round_up(rows, sub_mult))
        grid = (pl.cdiv(rows, tile_rows),)

        padded_total = rows * _LANE_TILE
        x_flat = x.reshape(-1)
        if padded_total != total:
            # TODO(synk): ragged (non-512-multiple) totals still pay one pad and one
            # slice HBM copy; the 512-aligned case is zero-copy outside the kernel.
            x_flat = jnp.pad(x_flat, (0, padded_total - total))
        x2d = x_flat.reshape(rows, _LANE_TILE)

        kernel = functools.partial(_lambda_kernel, fn=self.fn)

        out2d = pl.pallas_call(
            kernel,
            out_shape=jax.ShapeDtypeStruct((rows, _LANE_TILE), out_dtype),
            grid_spec=pltpu.PrefetchScalarGridSpec(
                num_scalar_prefetch=0,
                grid=grid,
                in_specs=[
                    pl.BlockSpec((tile_rows, _LANE_TILE), lambda i: (i, 0)),
                ],
                out_specs=pl.BlockSpec((tile_rows, _LANE_TILE), lambda i: (i, 0)),
            ),
            compiler_params=pltpu.CompilerParams(
                dimension_semantics=("parallel",),
                vmem_limit_bytes=_VMEM_LIMIT_BYTES,
            ),
            cost_estimate=pl.CostEstimate(
                flops=total,
                transcendentals=0,
                bytes_accessed=total * in_item + total * out_item,
            ),
        )(x2d)

        out_flat = out2d.reshape(-1)
        if padded_total != total:
            out_flat = out_flat[:total]
        return out_flat.reshape(orig_shape)


if __name__ == "__main__":
    # Deterministic example fn (what a Lambda might wrap in mdistiller).
    example_fn = lambda x: jax.nn.relu(x) * 2.0 + 0.5
    mod = PallasLambda(example_fn)

    key = jax.random.PRNGKey(0)
    k1, k2, k3 = jax.random.split(key, 3)

    # Small NCHW activation (2x4x16x16): takes the plain-fn fast path.
    x = jax.random.normal(k1, (2, 4, 16, 16), dtype=jnp.float32)
    y = jax.block_until_ready(mod(x))
    y_ref = example_fn(x)
    assert y.shape == x.shape and y.dtype == y_ref.dtype
    assert jnp.allclose(y, y_ref, atol=1e-6, rtol=1e-6)

    # Large 512-aligned activation: zero-copy kernel path, 2 grid steps.
    x_big = jax.random.normal(k2, (8, 64, 32, 32), dtype=jnp.float32)  # 524288 elems
    y_big = jax.block_until_ready(mod(x_big))
    assert y_big.shape == x_big.shape
    assert jnp.allclose(y_big, example_fn(x_big), atol=1e-6, rtol=1e-6)

    # Large ragged total (not a multiple of 512): pad + masked final row tile.
    x_rag = jax.random.normal(k3, (3, 523, 173), dtype=jnp.float32)    # 271437 elems
    y_rag = jax.block_until_ready(mod(x_rag))
    assert y_rag.shape == x_rag.shape
    assert jnp.allclose(y_rag, example_fn(x_rag), atol=1e-6, rtol=1e-6)

    # Dtype-promoting fn (bf16 -> f32) exercises the in+out tile budgeting.
    promote_fn = lambda x: jnp.exp(x.astype(jnp.float32))
    mod2 = PallasLambda(promote_fn)
    x_bf = jax.random.normal(k2, (512, 1024), dtype=jnp.bfloat16)
    y_bf = jax.block_until_ready(mod2(x_bf))
    assert y_bf.shape == x_bf.shape and y_bf.dtype == jnp.float32
    assert jnp.allclose(y_bf, promote_fn(x_bf), atol=1e-3, rtol=1e-3)

    print("KERNEL_OK")
</pallas_src>

<mosaic_0001>
module attributes {stable_mosaic.version = 11 : i64} {
  func.func @_lambda_kernel(%arg0: i32, %arg1: memref<512x512xf32, #tpu.memory_space<vmem>>, %arg2: memref<512x512xf32, #tpu.memory_space<vmem>>) attributes {dimension_semantics = [#tpu.dimension_semantics<parallel>], iteration_bounds = array<i64: 2>, scalar_prefetch = 0 : i64, scratch_operands = 0 : i64, tpu.core_type = #tpu.core_type<tc>, window_params = [{transform_indices = @transform_0, window_bounds = array<i64: 512, 512>}, {transform_indices = @transform_1, window_bounds = array<i64: 512, 512>}]} {
    %c0 = arith.constant 0 : index
    %c0_0 = arith.constant 0 : index
    %0 = vector.load %arg1[%c0, %c0_0] : memref<512x512xf32, #tpu.memory_space<vmem>>, vector<512x512xf32>
    %cst = arith.constant 0.000000e+00 : f32
    %1 = vector.broadcast %cst : f32 to vector<512x512xf32>
    %2 = arith.maximumf %0, %1 : vector<512x512xf32>
    %cst_1 = arith.constant 2.000000e+00 : f32
    %3 = vector.broadcast %cst_1 : f32 to vector<512x512xf32>
    %4 = arith.mulf %2, %3 : vector<512x512xf32>
    %cst_2 = arith.constant 5.000000e-01 : f32
    %5 = vector.broadcast %cst_2 : f32 to vector<512x512xf32>
    %6 = arith.addf %4, %5 : vector<512x512xf32>
    %c0_3 = arith.constant 0 : index
    %c0_4 = arith.constant 0 : index
    %7 = vector.load %arg2[%c0_3, %c0_4] : memref<512x512xf32, #tpu.memory_space<vmem>>, vector<512x512xf32>
    tpu.vector_store %arg2[%c0_3, %c0_4], %6 {strides = array<i32>} : memref<512x512xf32, #tpu.memory_space<vmem>>, vector<512x512xf32>,
    return
  }
  func.func @transform_0(%arg0: i32) -> (i32, i32) {
    %c0_i32 = arith.constant 0 : i32
    %c0_i32_0 = arith.constant 0 : i32
    return %arg0, %c0_i32 : i32, i32
  }
  func.func @transform_1(%arg0: i32) -> (i32, i32) {
    %c0_i32 = arith.constant 0 : i32
    %c0_i32_0 = arith.constant 0 : i32
    return %arg0, %c0_i32 : i32, i32
  }
}

</mosaic_0001>

<bundles_post_ra>
// kernel: tpu_custom_call.1
= control target key start
LH: loop header
LB: loop body
LE: loop exit
PB: predicated region body
PF: predicated region fallthrough
CT: control target
= control target key end

     0   :  { %6 = vsyncpa [#allocation3], 0  ;;  %s2373_s0 = inlined_call_operand.hbm [shape: f32[1024,512], index: 0, kind: input, shape index: {}]   ;;  %s2374_s1 = inlined_call_operand.hbm [shape: f32[1024,512], index: 1, kind: output, shape index: {}]  }
   0x1   :  { %8 = vsyncpa [#allocation3 + $0x1], 0 }
   0x2   :  { %9 = vsyncpa [#allocation4], 0 }
   0x3   :  { %11 = vsyncpa [#allocation4 + $0x1], 0  ;;  %s1690_s6 = smov 0   ;;  %s1692_s7 = smov 0  }
   0x4   :  { %s1694_s8 = smov 0   ;;  %s1696_s9 = smov 0  }
   0x5 LB: > { %s1711_s10 = sadd.s32 4294967295, %s1672_s9   ;;  %s1506_s11 = sadd.s32 4294967294, %s1672_s9   ;;  %s1672_s9 = sphi %s1696_s9, %s2387_s9   ;;  %s1668_s8 = sphi %s1694_s8, %s2386_s8   ;;  %s1664_s7 = sphi %s1692_s7, %s2385_s7   ;;  %s1660_s6 = sphi %s1690_s6, %s2384_s6  }
   0x6   : > { %s1715_s12 = sadd.s32 1, %s1672_s9   ;;  %s24_s13 = sadd.s32 1, %s1668_s8 }
   0x7   : > { %s21_s14 = ssub.s32 %s1672_s9, %s1715_s12  ;;  %p31_p0 = scmp.ne.s32.totalorder %s1668_s8, %s1664_s7 }
   0x8   : > { %p22_p1 = scmp.eq.s32.totalorder %s21_s14, 0  ;;  %p32_p2 = scmp.eq.s32.totalorder %s1672_s9, 0 }
   0x9   : > { %p37_p3 = scmp.ne.s32.totalorder %s1664_s7, %s1660_s6  ;;  %p38_p4 = scmp.eq.s32.totalorder %s1711_s10, 0 }
   0xa   : > { %s1727_s15 = scalar_select %p22_p1, %s1668_s8, %s24_s13  }
   0xb   : > { %p1729_p5 = por %p32_p2, %p31_p0  ;;  %p1733_p6 = por %p38_p4, %p37_p3 }
   0xc   : > { %p61_p7 = scmp.eq.s32.totalorder %s1711_s10, 1  ;;  %p67_p8 = scmp.eq.s32.totalorder %s1506_s11, 1 }
   0xd   : > { %p1538_p10 = scmp.lt.s32.totalorder %s1672_s9, 2  ;;  %s87_s20 = sand.u32 1, %s1668_s8  }
   0xe   : > { %p1740_p11 = por %p61_p7, %p31_p0  ;;  %p1744_p12 = por %p67_p8, %p37_p3 }
   0xf   : > { %s1523_s21 = sshll.u32 %s1672_s9, 15  ;;  %s1509_s22 = sshll.u32 %s87_s20, 11 }
  0x10   : > { %s2378_s18 = scalar_select %p1740_p11, 1, 0 }
  0x11   : > { %s2379_s19 = scalar_select %p1744_p12, 1, 0 }
  0x12   : > { %s1753_s25 = scalar_lea.hbm %s2373_s0, %s1523_s21  ;;  %s91_s26 = scalar_lea.vmem [#allocation2], %s1509_s22 }
  0x13   : > { %s99_s27 = sshll.u32 %s91_s26, 4  ;;  %p1757_p13 = pnand %p1538_p10, %p1729_p5  ;;  %s1761_s27 = int_to_ptr.vmem [resolvable:$true] %s99_s27 }
  0x14   : > { %s1763_s29 = scalar_lea.sflag [#allocation3], %s87_s20  ;;  %s1576_s30 = scalar_lea.hbm %s1753_s25, 32768 }
  0x15   : > { %p1577_p0 = scmp.ne.s32.totalorder %s1753_s25, %s1576_s30  ;;  %p1578_p1 = pneg %p1757_p13 }
  0x16   : > { %s1581_s4 = scalar_lea.hbm %s2373_s0, 65536  ;;  %p1582_p4 = scmp.lt.u32.totalorder %s1753_s25, %s2373_s0 }
  0x17   : > { %p1579_p2 = pnand %p1578_p1, %p1577_p0  ;;  %p1583_p5 = scmp.lt.u32.totalorder %s1581_s4, %s1576_s30 }
  0x18   : > { %p1585_p8 = scmp.lt.u32.totalorder %s1576_s30, %s1753_s25 }
  0x19   : > { %p1580_p3 = pneg %p1579_p2  ;;  %p1584_p7 = por %p1583_p5, %p1582_p4 }
  0x1b   : > { %p1586_p10 = por %p1585_p8, %p1584_p7 }
  0x1d   : > { %p1587_p9 = pnand %p1586_p10, %p1580_p3 }
  0x1f   : > { %1590 = shalt.err (!%p1587_p9)
}
  0x20   : > { %s1591_s13 = scalar_lea.vmem %s1761_s27, 32768  ;;  %s1674_s14 = smov [#allocation2]  }
  0x21   : > { %p1592_p0 = scmp.ne.s32.totalorder %s1761_s27, %s1591_s13  ;;  %s1596_s16 = sshll.u32 %s1674_s14, 4  ;;  %s1597_s16 = int_to_ptr.vmem [resolvable:$false] %s1596_s16 }
  0x22   : > { %s1598_s20 = scalar_lea.vmem %s1597_s16, 65536  ;;  %p1599_p11 = scmp.lt.s32.totalorder %s1761_s27, %s1597_s16 }
  0x23   : > { %p1594_p2 = pnand %p1592_p0, %p1578_p1  ;;  %p1600_p4 = scmp.lt.s32.totalorder %s1598_s20, %s1591_s13 }
  0x25   : > { %p1595_p12 = pneg %p1594_p2  ;;  %p1601_p5 = por %p1600_p4, %p1599_p11 }
  0x27   : > { %p1602_p7 = pnand %p1601_p5, %p1595_p12 }
  0x29   : > { %1605 = shalt.err (!%p1602_p7)
}
  0x2a   : > { %s1675_s21 = smov 512   ;;  %s1676_s22 = smov 32  }
  0x2b   : > { %1533 = dma.hbm_to_vmem [thread:$0]  (!%p1757_p13), %s1753_s25, 32768, %s1761_s27, %s1763_s29, %s1675_s21, %s1675_s21, %s1676_s22  }
  0x2c   : > { %p1513_p9 = scmp.ge.s32.totalorder %s1672_s9, 1  ;;  %p107_p1 = scmp.lt.s32.totalorder %s1672_s9, 3 }
  0x2e   : > { %p108_p3 = pnand %p1513_p9, %p107_p1 }
  0x2f   : > { %s1794_s23 = sand.u32 (!%p108_p3), 1, %s1664_s7  }
  0x30   : > { %111 = sbr.rel (%p108_p3) target bundleno = 292 (0x124), region = 24  ;;  %s1514_s24 = sshll.u32 (!%p108_p3), %s1794_s23, 11 }
  0x31   : > { %s114_s26 = scalar_lea.sflag (!%p108_p3), [#allocation3], %s1794_s23  ;;  %s1800_s30 = scalar_lea.vmem (!%p108_p3), [#allocation2], %s1514_s24 }
  0x37   : > { %1651 = dma.done.wait (%p1733_p6), %s114_s26, 32768  }
  0x38   : > { %1653 = vsyncadd (%p1733_p6), %s114_s26, 4294934528  ;;  %v138_v0 = vld [vmem:[%s1800_s30] sm:$0xff]  ;;  %v139_v1 = vld [vmem:[%s1800_s30 + $0x8] sm:$0xff]  ;;  %s1823_s17 = scalar_lea.vmem [#allocation5], %s1514_s24  ;;  %s1525_s25 = sshll.u32 %s1711_s10, 15 }
  0x39   : > { %v140_v2 = vld [vmem:[%s1800_s30 + $0x10] sm:$0xff]  ;;  %v394_v3 = vmax.f32 %v138_v0, 0.0  ;;  %v395_v4 = vmax.f32 %v139_v1, 0.0  ;;  %v141_v6 = vld [vmem:[%s1800_s30 + $0x18] sm:$0xff]  ;;  %v142_v7 = vld [vmem:[%s1800_s30 + $0x20] sm:$0xff]  ;;  %s1433_s27 = sshll.u32 %s1823_s17, 4  ;;  %s2322_s29 = scalar_lea.hbm %s2374_s1, %s1525_s25  ;;  %s2324_s27 = int_to_ptr.vmem [resolvable:$true] %s1433_s27 }
  0x3a   : > { %v396_v5 = vmax.f32 %v140_v2, 0.0  ;;  %v143_v8 = vld [vmem:[%s1800_s30 + $0x28] sm:$0xff]  ;;  %v397_v9 = vmax.f32 %v141_v6, 0.0  ;;  %v398_v10 = vmax.f32 %v142_v7, 0.0  ;;  %v144_v12 = vld [vmem:[%s1800_s30 + $0x30] sm:$0xff]  ;;  %v145_v13 = vld [vmem:[%s1800_s30 + $0x38] sm:$0xff] }
  0x3b   : > { %v399_v11 = vmax.f32 %v143_v8, 0.0  ;;  %v650_v14 = vmul.f32 2.0, %v394_v3  ;;  %v651_v15 = vmul.f32 2.0, %v395_v4  ;;  %v400_v17 = vmax.f32 %v144_v12, 0.0  ;;  %v146_v18 = vld [vmem:[%s1800_s30 + $0x40] sm:$0xff]  ;;  %v147_v19 = vld [vmem:[%s1800_s30 + $0x48] sm:$0xff] }
  0x3c   : > { %v652_v16 = vmul.f32 2.0, %v396_v5  ;;  %v653_v20 = vmul.f32 2.0, %v397_v9  ;;  %v654_v21 = vmul.f32 2.0, %v398_v10  ;;  %v401_v23 = vmax.f32 %v145_v13, 0.0  ;;  %v148_v24 = vld [vmem:[%s1800_s30 + $0x50] sm:$0xff]  ;;  %v149_v25 = vld [vmem:[%s1800_s30 + $0x58] sm:$0xff] }
  0x3d   : > { %v655_v22 = vmul.f32 2.0, %v399_v11  ;;  %v906_v26 = vadd.f32 0.5, %v650_v14  ;;  %v907_v27 = vadd.f32 0.5, %v651_v15  ;;  %v656_v29 = vmul.f32 2.0, %v400_v17  ;;  %v150_v30 = vld [vmem:[%s1800_s30 + $0x60] sm:$0xff]  ;;  %v151_v31 = vld [vmem:[%s1800_s30 + $0x68] sm:$0xff] }
  0x3e   : > { %v908_v28 = vadd.f32 0.5, %v652_v16  ;;  %v909_v32 = vadd.f32 0.5, %v653_v20  ;;  %v910_v33 = vadd.f32 0.5, %v654_v21  ;;  %v657_v35 = vmul.f32 2.0, %v401_v23  ;;  %v152_v36 = vld [vmem:[%s1800_s30 + $0x70] sm:$0xff]  ;;  %v153_v41 = vld [vmem:[%s1800_s30 + $0x78] sm:$0xff] }
  0x3f   : > { %v911_v34 = vadd.f32 0.5, %v655_v22  ;;  %1162 = vst [vmem:[%s1823_s17] sm:$0xff] %v906_v26  ;;  %1163 = vst [vmem:[%s1823_s17 + $0x8] sm:$0xff] %v907_v27  ;;  %v912_v37 = vadd.f32 0.5, %v656_v29  ;;  %v402_v38 = vmax.f32 %v146_v18, 0.0  ;;  %v403_v39 = vmax.f32 %v147_v19, 0.0  ;;  %v154_v50 = vld [vmem:[%s1800_s30 + $0x80] sm:$0xff] }
  0x40   : > { %1164 = vst [vmem:[%s1823_s17 + $0x10] sm:$0xff] %v908_v28  ;;  %v404_v40 = vmax.f32 %v148_v24, 0.0  ;;  %1165 = vst [vmem:[%s1823_s17 + $0x18] sm:$0xff] %v909_v32  ;;  %v913_v42 = vadd.f32 0.5, %v657_v35  ;;  %v405_v43 = vmax.f32 %v149_v25, 0.0  ;;  %v406_v44 = vmax.f32 %v150_v30, 0.0 }
  0x41   : > { %1166 = vst [vmem:[%s1823_s17 + $0x20] sm:$0xff] %v910_v33  ;;  %1167 = vst [vmem:[%s1823_s17 + $0x28] sm:$0xff] %v911_v34  ;;  %v407_v45 = vmax.f32 %v151_v31, 0.0  ;;  %v658_v46 = vmul.f32 2.0, %v402_v38  ;;  %v659_v47 = vmul.f32 2.0, %v403_v39  ;;  %v408_v49 = vmax.f32 %v152_v36, 0.0 }
  0x42   : > { %1168 = vst [vmem:[%s1823_s17 + $0x30] sm:$0xff] %v912_v37  ;;  %v660_v48 = vmul.f32 2.0, %v404_v40  ;;  %v155_v51 = vld [vmem:[%s1800_s30 + $0x88] sm:$0xff]  ;;  %1169 = vst [vmem:[%s1823_s17 + $0x38] sm:$0xff] %v913_v42  ;;  %v661_v52 = vmul.f32 2.0, %v405_v43  ;;  %v662_v53 = vmul.f32 2.0, %v406_v44 }
  0x43   : > { %v663_v54 = vmul.f32 2.0, %v407_v45  ;;  %v409_v55 = vmax.f32 %v153_v41, 0.0  ;;  %v156_v56 = vld [vmem:[%s1800_s30 + $0x90] sm:$0xff]  ;;  %v157_v57 = vld [vmem:[%s1800_s30 + $0x98] sm:$0xff]  ;;  %v914_v58 = vadd.f32 0.5, %v658_v46  ;;  %v915_v59 = vadd.f32 0.5, %v659_v47 }
  0x44   : > { %v916_v60 = vadd.f32 0.5, %v660_v48  ;;  %v664_v61 = vmul.f32 2.0, %v408_v49  ;;  %v158_v62 = vld [vmem:[%s1800_s30 + $0xa0] sm:$0xff]  ;;  %v159_v63 = vld [vmem:[%s1800_s30 + $0xa8] sm:$0xff]  ;;  %v917_v0 = vadd.f32 0.5, %v661_v52  ;;  %v918_v1 = vadd.f32 0.5, %v662_v53 }
  0x45   : > { %v919_v2 = vadd.f32 0.5, %v663_v54  ;;  %v665_v3 = vmul.f32 2.0, %v409_v55  ;;  %v160_v4 = vld [vmem:[%s1800_s30 + $0xb0] sm:$0xff]  ;;  %1170 = vst [vmem:[%s1823_s17 + $0x40] sm:$0xff] %v914_v58  ;;  %1171 = vst [vmem:[%s1823_s17 + $0x48] sm:$0xff] %v915_v59  ;;  %v410_v6 = vmax.f32 %v154_v50, 0.0 }
  0x46   : > { %1172 = vst [vmem:[%s1823_s17 + $0x50] sm:$0xff] %v916_v60  ;;  %v920_v5 = vadd.f32 0.5, %v664_v61  ;;  %v411_v7 = vmax.f32 %v155_v51, 0.0  ;;  %v412_v8 = vmax.f32 %v156_v56, 0.0  ;;  %v161_v9 = vld [vmem:[%s1800_s30 + $0xb8] sm:$0xff]  ;;  %1173 = vst [vmem:[%s1823_s17 + $0x58] sm:$0xff] %v917_v0 }
  0x47   : > { %1174 = vst [vmem:[%s1823_s17 + $0x60] sm:$0xff] %v918_v1  ;;  %1175 = vst [vmem:[%s1823_s17 + $0x68] sm:$0xff] %v919_v2  ;;  %v921_v10 = vadd.f32 0.5, %v665_v3  ;;  %v413_v11 = vmax.f32 %v157_v57, 0.0  ;;  %v414_v12 = vmax.f32 %v158_v62, 0.0  ;;  %v415_v13 = vmax.f32 %v159_v63, 0.0 }
  0x48   : > { %1176 = vst [vmem:[%s1823_s17 + $0x70] sm:$0xff] %v920_v5  ;;  %v666_v14 = vmul.f32 2.0, %v410_v6  ;;  %v667_v15 = vmul.f32 2.0, %v411_v7  ;;  %v668_v16 = vmul.f32 2.0, %v412_v8  ;;  %v416_v17 = vmax.f32 %v160_v4, 0.0  ;;  %v162_v18 = vld [vmem:[%s1800_s30 + $0xc0] sm:$0xff] }
  0x49   : > { %v163_v19 = vld [vmem:[%s1800_s30 + $0xc8] sm:$0xff]  ;;  %1177 = vst [vmem:[%s1823_s17 + $0x78] sm:$0xff] %v921_v10  ;;  %v669_v20 = vmul.f32 2.0, %v413_v11  ;;  %v670_v21 = vmul.f32 2.0, %v414_v12  ;;  %v671_v22 = vmul.f32 2.0, %v415_v13  ;;  %v417_v23 = vmax.f32 %v161_v9, 0.0 }
  0x4a   : > { %v164_v24 = vld [vmem:[%s1800_s30 + $0xd0] sm:$0xff]  ;;  %v165_v25 = vld [vmem:[%s1800_s30 + $0xd8] sm:$0xff]  ;;  %v922_v26 = vadd.f32 0.5, %v666_v14  ;;  %v923_v27 = vadd.f32 0.5, %v667_v15  ;;  %v924_v28 = vadd.f32 0.5, %v668_v16  ;;  %v672_v29 = vmul.f32 2.0, %v416_v17 }
  0x4b   : > { %v166_v30 = vld [vmem:[%s1800_s30 + $0xe0] sm:$0xff]  ;;  %v167_v31 = vld [vmem:[%s1800_s30 + $0xe8] sm:$0xff]  ;;  %v925_v32 = vadd.f32 0.5, %v669_v20  ;;  %v926_v33 = vadd.f32 0.5, %v670_v21  ;;  %v927_v34 = vadd.f32 0.5, %v671_v22  ;;  %v673_v35 = vmul.f32 2.0, %v417_v23 }
  0x4c   : > { %v168_v36 = vld [vmem:[%s1800_s30 + $0xf0] sm:$0xff]  ;;  %1178 = vst [vmem:[%s1823_s17 + $0x80] sm:$0xff] %v922_v26  ;;  %1179 = vst [vmem:[%s1823_s17 + $0x88] sm:$0xff] %v923_v27  ;;  %v928_v37 = vadd.f32 0.5, %v672_v29  ;;  %v418_v38 = vmax.f32 %v162_v18, 0.0  ;;  %v419_v39 = vmax.f32 %v163_v19, 0.0 }
  0x4d   : > { %1180 = vst [vmem:[%s1823_s17 + $0x90] sm:$0xff] %v924_v28  ;;  %v420_v40 = vmax.f32 %v164_v24, 0.0  ;;  %v169_v41 = vld [vmem:[%s1800_s30 + $0xf8] sm:$0xff]  ;;  %1181 = vst [vmem:[%s1823_s17 + $0x98] sm:$0xff] %v925_v32  ;;  %v929_v42 = vadd.f32 0.5, %v673_v35  ;;  %v421_v43 = vmax.f32 %v165_v25, 0.0 }
  0x4e   : > { %1182 = vst [vmem:[%s1823_s17 + $0xa0] sm:$0xff] %v926_v33  ;;  %1183 = vst [vmem:[%s1823_s17 + $0xa8] sm:$0xff] %v927_v34  ;;  %v422_v44 = vmax.f32 %v166_v30, 0.0  ;;  %v423_v45 = vmax.f32 %v167_v31, 0.0  ;;  %v674_v46 = vmul.f32 2.0, %v418_v38  ;;  %v675_v47 = vmul.f32 2.0, %v419_v39 }
  0x4f   : > { %1184 = vst [vmem:[%s1823_s17 + $0xb0] sm:$0xff] %v928_v37  ;;  %v676_v48 = vmul.f32 2.0, %v420_v40  ;;  %v424_v49 = vmax.f32 %v168_v36, 0.0  ;;  %v170_v50 = vld [vmem:[%s1800_s30 + $0x100] sm:$0xff]  ;;  %v171_v51 = vld [vmem:[%s1800_s30 + $0x108] sm:$0xff]  ;;  %1185 = vst [vmem:[%s1823_s17 + $0xb8] sm:$0xff] %v929_v42 }
  0x50   : > { %v677_v52 = vmul.f32 2.0, %v421_v43  ;;  %v678_v53 = vmul.f32 2.0, %v422_v44  ;;  %v679_v54 = vmul.f32 2.0, %v423_v45  ;;  %v425_v55 = vmax.f32 %v169_v41, 0.0  ;;  %v172_v56 = vld [vmem:[%s1800_s30 + $0x110] sm:$0xff]  ;;  %v173_v57 = vld [vmem:[%s1800_s30 + $0x118] sm:$0xff] }
  0x51   : > { %v930_v58 = vadd.f32 0.5, %v674_v46  ;;  %v931_v59 = vadd.f32 0.5, %v675_v47  ;;  %v932_v60 = vadd.f32 0.5, %v676_v48  ;;  %v680_v61 = vmul.f32 2.0, %v424_v49  ;;  %v174_v62 = vld [vmem:[%s1800_s30 + $0x120] sm:$0xff]  ;;  %v175_v63 = vld [vmem:[%s1800_s30 + $0x128] sm:$0xff] }
  0x52   : > { %v933_v0 = vadd.f32 0.5, %v677_v52  ;;  %v934_v1 = vadd.f32 0.5, %v678_v53  ;;  %v935_v2 = vadd.f32 0.5, %v679_v54  ;;  %v681_v3 = vmul.f32 2.0, %v425_v55  ;;  %v176_v4 = vld [vmem:[%s1800_s30 + $0x130] sm:$0xff]  ;;  %v177_v9 = vld [vmem:[%s1800_s30 + $0x138] sm:$0xff] }
  0x53   : > { %1186 = vst [vmem:[%s1823_s17 + $0xc0] sm:$0xff] %v930_v58  ;;  %1187 = vst [vmem:[%s1823_s17 + $0xc8] sm:$0xff] %v931_v59  ;;  %v936_v5 = vadd.f32 0.5, %v680_v61  ;;  %v426_v6 = vmax.f32 %v170_v50, 0.0  ;;  %v427_v7 = vmax.f32 %v171_v51, 0.0  ;;  %v428_v8 = vmax.f32 %v172_v56, 0.0 }
  0x54   : > { %1188 = vst [vmem:[%s1823_s17 + $0xd0] sm:$0xff] %v932_v60  ;;  %1189 = vst [vmem:[%s1823_s17 + $0xd8] sm:$0xff] %v933_v0  ;;  %v937_v10 = vadd.f32 0.5, %v681_v3  ;;  %v429_v11 = vmax.f32 %v173_v57, 0.0  ;;  %v430_v12 = vmax.f32 %v174_v62, 0.0  ;;  %v431_v13 = vmax.f32 %v175_v63, 0.0 }
  0x55   : > { %1190 = vst [vmem:[%s1823_s17 + $0xe0] sm:$0xff] %v934_v1  ;;  %1191 = vst [vmem:[%s1823_s17 + $0xe8] sm:$0xff] %v935_v2  ;;  %v682_v14 = vmul.f32 2.0, %v426_v6  ;;  %v683_v15 = vmul.f32 2.0, %v427_v7  ;;  %v684_v16 = vmul.f32 2.0, %v428_v8  ;;  %v432_v17 = vmax.f32 %v176_v4, 0.0 }
  0x56   : > { %1192 = vst [vmem:[%s1823_s17 + $0xf0] sm:$0xff] %v936_v5  ;;  %v178_v18 = vld [vmem:[%s1800_s30 + $0x140] sm:$0xff]  ;;  %v179_v19 = vld [vmem:[%s1800_s30 + $0x148] sm:$0xff]  ;;  %1193 = vst [vmem:[%s1823_s17 + $0xf8] sm:$0xff] %v937_v10  ;;  %v685_v20 = vmul.f32 2.0, %v429_v11  ;;  %v686_v21 = vmul.f32 2.0, %v430_v12 }
  0x57   : > { %v687_v22 = vmul.f32 2.0, %v431_v13  ;;  %v433_v23 = vmax.f32 %v177_v9, 0.0  ;;  %v180_v24 = vld [vmem:[%s1800_s30 + $0x150] sm:$0xff]  ;;  %v181_v25 = vld [vmem:[%s1800_s30 + $0x158] sm:$0xff]  ;;  %v938_v26 = vadd.f32 0.5, %v682_v14  ;;  %v939_v27 = vadd.f32 0.5, %v683_v15 }
  0x58   : > { %v940_v28 = vadd.f32 0.5, %v684_v16  ;;  %v688_v29 = vmul.f32 2.0, %v432_v17  ;;  %v182_v30 = vld [vmem:[%s1800_s30 + $0x160] sm:$0xff]  ;;  %v183_v31 = vld [vmem:[%s1800_s30 + $0x168] sm:$0xff]  ;;  %v941_v32 = vadd.f32 0.5, %v685_v20  ;;  %v942_v33 = vadd.f32 0.5, %v686_v21 }
  0x59   : > { %v943_v34 = vadd.f32 0.5, %v687_v22  ;;  %v689_v35 = vmul.f32 2.0, %v433_v23  ;;  %v184_v36 = vld [vmem:[%s1800_s30 + $0x170] sm:$0xff]  ;;  %1194 = vst [vmem:[%s1823_s17 + $0x100] sm:$0xff] %v938_v26  ;;  %1195 = vst [vmem:[%s1823_s17 + $0x108] sm:$0xff] %v939_v27  ;;  %v434_v38 = vmax.f32 %v178_v18, 0.0 }
  0x5a   : > { %1196 = vst [vmem:[%s1823_s17 + $0x110] sm:$0xff] %v940_v28  ;;  %v944_v37 = vadd.f32 0.5, %v688_v29  ;;  %v435_v39 = vmax.f32 %v179_v19, 0.0  ;;  %v436_v40 = vmax.f32 %v180_v24, 0.0  ;;  %v185_v41 = vld [vmem:[%s1800_s30 + $0x178] sm:$0xff]  ;;  %1197 = vst [vmem:[%s1823_s17 + $0x118] sm:$0xff] %v941_v32 }
  0x5b   : > { %1198 = vst [vmem:[%s1823_s17 + $0x120] sm:$0xff] %v942_v33  ;;  %1199 = vst [vmem:[%s1823_s17 + $0x128] sm:$0xff] %v943_v34  ;;  %v945_v42 = vadd.f32 0.5, %v689_v35  ;;  %v437_v43 = vmax.f32 %v181_v25, 0.0  ;;  %v438_v44 = vmax.f32 %v182_v30, 0.0  ;;  %v439_v45 = vmax.f32 %v183_v31, 0.0 }
  0x5c   : > { %1200 = vst [vmem:[%s1823_s17 + $0x130] sm:$0xff] %v944_v37  ;;  %v690_v46 = vmul.f32 2.0, %v434_v38  ;;  %v691_v47 = vmul.f32 2.0, %v435_v39  ;;  %v692_v48 = vmul.f32 2.0, %v436_v40  ;;  %v440_v49 = vmax.f32 %v184_v36, 0.0  ;;  %v186_v50 = vld [vmem:[%s1800_s30 + $0x180] sm:$0xff] }
  0x5d   : > { %v187_v51 = vld [vmem:[%s1800_s30 + $0x188] sm:$0xff]  ;;  %1201 = vst [vmem:[%s1823_s17 + $0x138] sm:$0xff] %v945_v42  ;;  %v693_v52 = vmul.f32 2.0, %v437_v43  ;;  %v694_v53 = vmul.f32 2.0, %v438_v44  ;;  %v695_v54 = vmul.f32 2.0, %v439_v45  ;;  %v441_v55 = vmax.f32 %v185_v41, 0.0 }
  0x5e   : > { %v188_v56 = vld [vmem:[%s1800_s30 + $0x190] sm:$0xff]  ;;  %v189_v57 = vld [vmem:[%s1800_s30 + $0x198] sm:$0xff]  ;;  %v946_v58 = vadd.f32 0.5, %v690_v46  ;;  %v947_v59 = vadd.f32 0.5, %v691_v47  ;;  %v948_v60 = vadd.f32 0.5, %v692_v48  ;;  %v696_v61 = vmul.f32 2.0, %v440_v49 }
  0x5f   : > { %v190_v62 = vld [vmem:[%s1800_s30 + $0x1a0] sm:$0xff]  ;;  %v191_v63 = vld [vmem:[%s1800_s30 + $0x1a8] sm:$0xff]  ;;  %v949_v0 = vadd.f32 0.5, %v693_v52  ;;  %v950_v1 = vadd.f32 0.5, %v694_v53  ;;  %v951_v2 = vadd.f32 0.5, %v695_v54  ;;  %v697_v3 = vmul.f32 2.0, %v441_v55 }
  0x60   : > { %v192_v4 = vld [vmem:[%s1800_s30 + $0x1b0] sm:$0xff]  ;;  %1202 = vst [vmem:[%s1823_s17 + $0x140] sm:$0xff] %v946_v58  ;;  %1203 = vst [vmem:[%s1823_s17 + $0x148] sm:$0xff] %v947_v59  ;;  %v952_v5 = vadd.f32 0.5, %v696_v61  ;;  %v442_v6 = vmax.f32 %v186_v50, 0.0  ;;  %v443_v7 = vmax.f32 %v187_v51, 0.0 }
  0x61   : > { %1204 = vst [vmem:[%s1823_s17 + $0x150] sm:$0xff] %v948_v60  ;;  %v444_v8 = vmax.f32 %v188_v56, 0.0  ;;  %v193_v9 = vld [vmem:[%s1800_s30 + $0x1b8] sm:$0xff]  ;;  %1205 = vst [vmem:[%s1823_s17 + $0x158] sm:$0xff] %v949_v0  ;;  %v953_v10 = vadd.f32 0.5, %v697_v3  ;;  %v445_v11 = vmax.f32 %v189_v57, 0.0 }
  0x62   : > { %1206 = vst [vmem:[%s1823_s17 + $0x160] sm:$0xff] %v950_v1  ;;  %1207 = vst [vmem:[%s1823_s17 + $0x168] sm:$0xff] %v951_v2  ;;  %v446_v12 = vmax.f32 %v190_v62, 0.0  ;;  %v447_v13 = vmax.f32 %v191_v63, 0.0  ;;  %v698_v14 = vmul.f32 2.0, %v442_v6  ;;  %v699_v15 = vmul.f32 2.0, %v443_v7 }
  0x63   : > { %1208 = vst [vmem:[%s1823_s17 + $0x170] sm:$0xff] %v952_v5  ;;  %v700_v16 = vmul.f32 2.0, %v444_v8  ;;  %v448_v17 = vmax.f32 %v192_v4, 0.0  ;;  %v194_v18 = vld [vmem:[%s1800_s30 + $0x1c0] sm:$0xff]  ;;  %v195_v19 = vld [vmem:[%s1800_s30 + $0x1c8] sm:$0xff]  ;;  %1209 = vst [vmem:[%s1823_s17 + $0x178] sm:$0xff] %v953_v10 }
  0x64   : > { %v701_v20 = vmul.f32 2.0, %v445_v11  ;;  %v702_v21 = vmul.f32 2.0, %v446_v12  ;;  %v703_v22 = vmul.f32 2.0, %v447_v13  ;;  %v449_v23 = vmax.f32 %v193_v9, 0.0  ;;  %v196_v24 = vld [vmem:[%s1800_s30 + $0x1d0] sm:$0xff]  ;;  %v197_v25 = vld [vmem:[%s1800_s30 + $0x1d8] sm:$0xff] }
  0x65   : > { %v954_v26 = vadd.f32 0.5, %v698_v14  ;;  %v955_v27 = vadd.f32 0.5, %v699_v15  ;;  %v956_v28 = vadd.f32 0.5, %v700_v16  ;;  %v704_v29 = vmul.f32 2.0, %v448_v17  ;;  %v198_v30 = vld [vmem:[%s1800_s30 + $0x1e0] sm:$0xff]  ;;  %v199_v31 = vld [vmem:[%s1800_s30 + $0x1e8] sm:$0xff] }
  0x66   : > { %v957_v32 = vadd.f32 0.5, %v701_v20  ;;  %v958_v33 = vadd.f32 0.5, %v702_v21  ;;  %v959_v34 = vadd.f32 0.5, %v703_v22  ;;  %v705_v35 = vmul.f32 2.0, %v449_v23  ;;  %v200_v36 = vld [vmem:[%s1800_s30 + $0x1f0] sm:$0xff]  ;;  %v201_v41 = vld [vmem:[%s1800_s30 + $0x1f8] sm:$0xff] }
  0x67   : > { %1210 = vst [vmem:[%s1823_s17 + $0x180] sm:$0xff] %v954_v26  ;;  %1211 = vst [vmem:[%s1823_s17 + $0x188] sm:$0xff] %v955_v27  ;;  %v960_v37 = vadd.f32 0.5, %v704_v29  ;;  %v450_v38 = vmax.f32 %v194_v18, 0.0  ;;  %v451_v39 = vmax.f32 %v195_v19, 0.0  ;;  %v452_v40 = vmax.f32 %v196_v24, 0.0 }
  0x68   : > { %1212 = vst [vmem:[%s1823_s17 + $0x190] sm:$0xff] %v956_v28  ;;  %1213 = vst [vmem:[%s1823_s17 + $0x198] sm:$0xff] %v957_v32  ;;  %v961_v42 = vadd.f32 0.5, %v705_v35  ;;  %v453_v43 = vmax.f32 %v197_v25, 0.0  ;;  %v454_v44 = vmax.f32 %v198_v30, 0.0  ;;  %v455_v45 = vmax.f32 %v199_v31, 0.0 }
  0x69   : > { %1214 = vst [vmem:[%s1823_s17 + $0x1a0] sm:$0xff] %v958_v33  ;;  %1215 = vst [vmem:[%s1823_s17 + $0x1a8] sm:$0xff] %v959_v34  ;;  %v706_v46 = vmul.f32 2.0, %v450_v38  ;;  %v707_v47 = vmul.f32 2.0, %v451_v39  ;;  %v708_v48 = vmul.f32 2.0, %v452_v40  ;;  %v456_v49 = vmax.f32 %v200_v36, 0.0 }
  0x6a   : > { %1216 = vst [vmem:[%s1823_s17 + $0x1b0] sm:$0xff] %v960_v37  ;;  %v202_v50 = vld [vmem:[%s1800_s30 + $0x200] sm:$0xff]  ;;  %v203_v51 = vld [vmem:[%s1800_s30 + $0x208] sm:$0xff]  ;;  %1217 = vst [vmem:[%s1823_s17 + $0x1b8] sm:$0xff] %v961_v42  ;;  %v709_v52 = vmul.f32 2.0, %v453_v43  ;;  %v710_v53 = vmul.f32 2.0, %v454_v44 }
  0x6b   : > { %v711_v54 = vmul.f32 2.0, %v455_v45  ;;  %v457_v55 = vmax.f32 %v201_v41, 0.0  ;;  %v204_v56 = vld [vmem:[%s1800_s30 + $0x210] sm:$0xff]  ;;  %v205_v57 = vld [vmem:[%s1800_s30 + $0x218] sm:$0xff]  ;;  %v962_v58 = vadd.f32 0.5, %v706_v46  ;;  %v963_v59 = vadd.f32 0.5, %v707_v47 }
  0x6c   : > { %v964_v60 = vadd.f32 0.5, %v708_v48  ;;  %v712_v61 = vmul.f32 2.0, %v456_v49  ;;  %v206_v62 = vld [vmem:[%s1800_s30 + $0x220] sm:$0xff]  ;;  %v207_v63 = vld [vmem:[%s1800_s30 + $0x228] sm:$0xff]  ;;  %v965_v0 = vadd.f32 0.5, %v709_v52  ;;  %v966_v1 = vadd.f32 0.5, %v710_v53 }
  0x6d   : > { %v967_v2 = vadd.f32 0.5, %v711_v54  ;;  %v713_v3 = vmul.f32 2.0, %v457_v55  ;;  %v208_v4 = vld [vmem:[%s1800_s30 + $0x230] sm:$0xff]  ;;  %1218 = vst [vmem:[%s1823_s17 + $0x1c0] sm:$0xff] %v962_v58  ;;  %1219 = vst [vmem:[%s1823_s17 + $0x1c8] sm:$0xff] %v963_v59  ;;  %v458_v6 = vmax.f32 %v202_v50, 0.0 }
  0x6e   : > { %1220 = vst [vmem:[%s1823_s17 + $0x1d0] sm:$0xff] %v964_v60  ;;  %v968_v5 = vadd.f32 0.5, %v712_v61  ;;  %v459_v7 = vmax.f32 %v203_v51, 0.0  ;;  %v460_v8 = vmax.f32 %v204_v56, 0.0  ;;  %v209_v9 = vld [vmem:[%s1800_s30 + $0x238] sm:$0xff]  ;;  %1221 = vst [vmem:[%s1823_s17 + $0x1d8] sm:$0xff] %v965_v0 }
  0x6f   : > { %1222 = vst [vmem:[%s1823_s17 + $0x1e0] sm:$0xff] %v966_v1  ;;  %1223 = vst [vmem:[%s1823_s17 + $0x1e8] sm:$0xff] %v967_v2  ;;  %v969_v10 = vadd.f32 0.5, %v713_v3  ;;  %v461_v11 = vmax.f32 %v205_v57, 0.0  ;;  %v462_v12 = vmax.f32 %v206_v62, 0.0  ;;  %v463_v13 = vmax.f32 %v207_v63, 0.0 }
  0x70   : > { %1224 = vst [vmem:[%s1823_s17 + $0x1f0] sm:$0xff] %v968_v5  ;;  %v714_v14 = vmul.f32 2.0, %v458_v6  ;;  %v715_v15 = vmul.f32 2.0, %v459_v7  ;;  %v716_v16 = vmul.f32 2.0, %v460_v8  ;;  %v464_v17 = vmax.f32 %v208_v4, 0.0  ;;  %v210_v18 = vld [vmem:[%s1800_s30 + $0x240] sm:$0xff] }
  0x71   : > { %v211_v19 = vld [vmem:[%s1800_s30 + $0x248] sm:$0xff]  ;;  %1225 = vst [vmem:[%s1823_s17 + $0x1f8] sm:$0xff] %v969_v10  ;;  %v717_v20 = vmul.f32 2.0, %v461_v11  ;;  %v718_v21 = vmul.f32 2.0, %v462_v12  ;;  %v719_v22 = vmul.f32 2.0, %v463_v13  ;;  %v465_v23 = vmax.f32 %v209_v9, 0.0 }
  0x72   : > { %v212_v24 = vld [vmem:[%s1800_s30 + $0x250] sm:$0xff]  ;;  %v213_v25 = vld [vmem:[%s1800_s30 + $0x258] sm:$0xff]  ;;  %v970_v26 = vadd.f32 0.5, %v714_v14  ;;  %v971_v27 = vadd.f32 0.5, %v715_v15  ;;  %v972_v28 = vadd.f32 0.5, %v716_v16  ;;  %v720_v29 = vmul.f32 2.0, %v464_v17 }
  0x73   : > { %v214_v30 = vld [vmem:[%s1800_s30 + $0x260] sm:$0xff]  ;;  %v215_v31 = vld [vmem:[%s1800_s30 + $0x268] sm:$0xff]  ;;  %v973_v32 = vadd.f32 0.5, %v717_v20  ;;  %v974_v33 = vadd.f32 0.5, %v718_v21  ;;  %v975_v34 = vadd.f32 0.5, %v719_v22  ;;  %v721_v35 = vmul.f32 2.0, %v465_v23 }
  0x74   : > { %v216_v36 = vld [vmem:[%s1800_s30 + $0x270] sm:$0xff]  ;;  %1226 = vst [vmem:[%s1823_s17 + $0x200] sm:$0xff] %v970_v26  ;;  %1227 = vst [vmem:[%s1823_s17 + $0x208] sm:$0xff] %v971_v27  ;;  %v976_v37 = vadd.f32 0.5, %v720_v29  ;;  %v466_v38 = vmax.f32 %v210_v18, 0.0  ;;  %v467_v39 = vmax.f32 %v211_v19, 0.0 }
  0x75   : > { %1228 = vst [vmem:[%s1823_s17 + $0x210] sm:$0xff] %v972_v28  ;;  %v468_v40 = vmax.f32 %v212_v24, 0.0  ;;  %v217_v41 = vld [vmem:[%s1800_s30 + $0x278] sm:$0xff]  ;;  %1229 = vst [vmem:[%s1823_s17 + $0x218] sm:$0xff] %v973_v32  ;;  %v977_v42 = vadd.f32 0.5, %v721_v35  ;;  %v469_v43 = vmax.f32 %v213_v25, 0.0 }
  0x76   : > { %1230 = vst [vmem:[%s1823_s17 + $0x220] sm:$0xff] %v974_v33  ;;  %1231 = vst [vmem:[%s1823_s17 + $0x228] sm:$0xff] %v975_v34  ;;  %v470_v44 = vmax.f32 %v214_v30, 0.0  ;;  %v471_v45 = vmax.f32 %v215_v31, 0.0  ;;  %v722_v46 = vmul.f32 2.0, %v466_v38  ;;  %v723_v47 = vmul.f32 2.0, %v467_v39 }
  0x77   : > { %1232 = vst [vmem:[%s1823_s17 + $0x230] sm:$0xff] %v976_v37  ;;  %v724_v48 = vmul.f32 2.0, %v468_v40  ;;  %v472_v49 = vmax.f32 %v216_v36, 0.0  ;;  %v218_v50 = vld [vmem:[%s1800_s30 + $0x280] sm:$0xff]  ;;  %v219_v51 = vld [vmem:[%s1800_s30 + $0x288] sm:$0xff]  ;;  %1233 = vst [vmem:[%s1823_s17 + $0x238] sm:$0xff] %v977_v42 }
  0x78   : > { %v725_v52 = vmul.f32 2.0, %v469_v43  ;;  %v726_v53 = vmul.f32 2.0, %v470_v44  ;;  %v727_v54 = vmul.f32 2.0, %v471_v45  ;;  %v473_v55 = vmax.f32 %v217_v41, 0.0  ;;  %v220_v56 = vld [vmem:[%s1800_s30 + $0x290] sm:$0xff]  ;;  %v221_v57 = vld [vmem:[%s1800_s30 + $0x298] sm:$0xff] }
  0x79   : > { %v978_v58 = vadd.f32 0.5, %v722_v46  ;;  %v979_v59 = vadd.f32 0.5, %v723_v47  ;;  %v980_v60 = vadd.f32 0.5, %v724_v48  ;;  %v728_v61 = vmul.f32 2.0, %v472_v49  ;;  %v222_v62 = vld [vmem:[%s1800_s30 + $0x2a0] sm:$0xff]  ;;  %v223_v63 = vld [vmem:[%s1800_s30 + $0x2a8] sm:$0xff] }
  0x7a   : > { %v981_v0 = vadd.f32 0.5, %v725_v52  ;;  %v982_v1 = vadd.f32 0.5, %v726_v53  ;;  %v983_v2 = vadd.f32 0.5, %v727_v54  ;;  %v729_v3 = vmul.f32 2.0, %v473_v55  ;;  %v224_v4 = vld [vmem:[%s1800_s30 + $0x2b0] sm:$0xff]  ;;  %v225_v9 = vld [vmem:[%s1800_s30 + $0x2b8] sm:$0xff] }
  0x7b   : > { %1234 = vst [vmem:[%s1823_s17 + $0x240] sm:$0xff] %v978_v58  ;;  %1235 = vst [vmem:[%s1823_s17 + $0x248] sm:$0xff] %v979_v59  ;;  %v984_v5 = vadd.f32 0.5, %v728_v61  ;;  %v474_v6 = vmax.f32 %v218_v50, 0.0  ;;  %v475_v7 = vmax.f32 %v219_v51, 0.0  ;;  %v476_v8 = vmax.f32 %v220_v56, 0.0 }
  0x7c   : > { %1236 = vst [vmem:[%s1823_s17 + $0x250] sm:$0xff] %v980_v60  ;;  %1237 = vst [vmem:[%s1823_s17 + $0x258] sm:$0xff] %v981_v0  ;;  %v985_v10 = vadd.f32 0.5, %v729_v3  ;;  %v477_v11 = vmax.f32 %v221_v57, 0.0  ;;  %v478_v12 = vmax.f32 %v222_v62, 0.0  ;;  %v479_v13 = vmax.f32 %v223_v63, 0.0 }
  0x7d   : > { %1238 = vst [vmem:[%s1823_s17 + $0x260] sm:$0xff] %v982_v1  ;;  %1239 = vst [vmem:[%s1823_s17 + $0x268] sm:$0xff] %v983_v2  ;;  %v730_v14 = vmul.f32 2.0, %v474_v6  ;;  %v731_v15 = vmul.f32 2.0, %v475_v7  ;;  %v732_v16 = vmul.f32 2.0, %v476_v8  ;;  %v480_v17 = vmax.f32 %v224_v4, 0.0 }
  0x7e   : > { %1240 = vst [vmem:[%s1823_s17 + $0x270] sm:$0xff] %v984_v5  ;;  %v226_v18 = vld [vmem:[%s1800_s30 + $0x2c0] sm:$0xff]  ;;  %v227_v19 = vld [vmem:[%s1800_s30 + $0x2c8] sm:$0xff]  ;;  %1241 = vst [vmem:[%s1823_s17 + $0x278] sm:$0xff] %v985_v10  ;;  %v733_v20 = vmul.f32 2.0, %v477_v11  ;;  %v734_v21 = vmul.f32 2.0, %v478_v12 }
  0x7f   : > { %v735_v22 = vmul.f32 2.0, %v479_v13  ;;  %v481_v23 = vmax.f32 %v225_v9, 0.0  ;;  %v228_v24 = vld [vmem:[%s1800_s30 + $0x2d0] sm:$0xff]  ;;  %v229_v25 = vld [vmem:[%s1800_s30 + $0x2d8] sm:$0xff]  ;;  %v986_v26 = vadd.f32 0.5, %v730_v14  ;;  %v987_v27 = vadd.f32 0.5, %v731_v15 }
  0x80   : > { %v988_v28 = vadd.f32 0.5, %v732_v16  ;;  %v736_v29 = vmul.f32 2.0, %v480_v17  ;;  %v230_v30 = vld [vmem:[%s1800_s30 + $0x2e0] sm:$0xff]  ;;  %v231_v31 = vld [vmem:[%s1800_s30 + $0x2e8] sm:$0xff]  ;;  %v989_v32 = vadd.f32 0.5, %v733_v20  ;;  %v990_v33 = vadd.f32 0.5, %v734_v21 }
  0x81   : > { %v991_v34 = vadd.f32 0.5, %v735_v22  ;;  %v737_v35 = vmul.f32 2.0, %v481_v23  ;;  %v232_v36 = vld [vmem:[%s1800_s30 + $0x2f0] sm:$0xff]  ;;  %1242 = vst [vmem:[%s1823_s17 + $0x280] sm:$0xff] %v986_v26  ;;  %1243 = vst [vmem:[%s1823_s17 + $0x288] sm:$0xff] %v987_v27  ;;  %v482_v38 = vmax.f32 %v226_v18, 0.0 }
  0x82   : > { %1244 = vst [vmem:[%s1823_s17 + $0x290] sm:$0xff] %v988_v28  ;;  %v992_v37 = vadd.f32 0.5, %v736_v29  ;;  %v483_v39 = vmax.f32 %v227_v19, 0.0  ;;  %v484_v40 = vmax.f32 %v228_v24, 0.0  ;;  %v233_v41 = vld [vmem:[%s1800_s30 + $0x2f8] sm:$0xff]  ;;  %1245 = vst [vmem:[%s1823_s17 + $0x298] sm:$0xff] %v989_v32 }
  0x83   : > { %1246 = vst [vmem:[%s1823_s17 + $0x2a0] sm:$0xff] %v990_v33  ;;  %1247 = vst [vmem:[%s1823_s17 + $0x2a8] sm:$0xff] %v991_v34  ;;  %v993_v42 = vadd.f32 0.5, %v737_v35  ;;  %v485_v43 = vmax.f32 %v229_v25, 0.0  ;;  %v486_v44 = vmax.f32 %v230_v30, 0.0  ;;  %v487_v45 = vmax.f32 %v231_v31, 0.0 }
  0x84   : > { %1248 = vst [vmem:[%s1823_s17 + $0x2b0] sm:$0xff] %v992_v37  ;;  %v738_v46 = vmul.f32 2.0, %v482_v38  ;;  %v739_v47 = vmul.f32 2.0, %v483_v39  ;;  %v740_v48 = vmul.f32 2.0, %v484_v40  ;;  %v488_v49 = vmax.f32 %v232_v36, 0.0  ;;  %v234_v50 = vld [vmem:[%s1800_s30 + $0x300] sm:$0xff] }
  0x85   : > { %v235_v51 = vld [vmem:[%s1800_s30 + $0x308] sm:$0xff]  ;;  %1249 = vst [vmem:[%s1823_s17 + $0x2b8] sm:$0xff] %v993_v42  ;;  %v741_v52 = vmul.f32 2.0, %v485_v43  ;;  %v742_v53 = vmul.f32 2.0, %v486_v44  ;;  %v743_v54 = vmul.f32 2.0, %v487_v45  ;;  %v489_v55 = vmax.f32 %v233_v41, 0.0 }
  0x86   : > { %v236_v56 = vld [vmem:[%s1800_s30 + $0x310] sm:$0xff]  ;;  %v237_v57 = vld [vmem:[%s1800_s30 + $0x318] sm:$0xff]  ;;  %v994_v58 = vadd.f32 0.5, %v738_v46  ;;  %v995_v59 = vadd.f32 0.5, %v739_v47  ;;  %v996_v60 = vadd.f32 0.5, %v740_v48  ;;  %v744_v61 = vmul.f32 2.0, %v488_v49 }
  0x87   : > { %v238_v62 = vld [vmem:[%s1800_s30 + $0x320] sm:$0xff]  ;;  %v239_v63 = vld [vmem:[%s1800_s30 + $0x328] sm:$0xff]  ;;  %v997_v0 = vadd.f32 0.5, %v741_v52  ;;  %v998_v1 = vadd.f32 0.5, %v742_v53  ;;  %v999_v2 = vadd.f32 0.5, %v743_v54  ;;  %v745_v3 = vmul.f32 2.0, %v489_v55 }
  0x88   : > { %v240_v4 = vld [vmem:[%s1800_s30 + $0x330] sm:$0xff]  ;;  %1250 = vst [vmem:[%s1823_s17 + $0x2c0] sm:$0xff] %v994_v58  ;;  %1251 = vst [vmem:[%s1823_s17 + $0x2c8] sm:$0xff] %v995_v59  ;;  %v1000_v5 = vadd.f32 0.5, %v744_v61  ;;  %v490_v6 = vmax.f32 %v234_v50, 0.0  ;;  %v491_v7 = vmax.f32 %v235_v51, 0.0 }
  0x89   : > { %1252 = vst [vmem:[%s1823_s17 + $0x2d0] sm:$0xff] %v996_v60  ;;  %v492_v8 = vmax.f32 %v236_v56, 0.0  ;;  %v241_v9 = vld [vmem:[%s1800_s30 + $0x338] sm:$0xff]  ;;  %1253 = vst [vmem:[%s1823_s17 + $0x2d8] sm:$0xff] %v997_v0  ;;  %v1001_v10 = vadd.f32 0.5, %v745_v3  ;;  %v493_v11 = vmax.f32 %v237_v57, 0.0 }
  0x8a   : > { %1254 = vst [vmem:[%s1823_s17 + $0x2e0] sm:$0xff] %v998_v1  ;;  %1255 = vst [vmem:[%s1823_s17 + $0x2e8] sm:$0xff] %v999_v2  ;;  %v494_v12 = vmax.f32 %v238_v62, 0.0  ;;  %v495_v13 = vmax.f32 %v239_v63, 0.0  ;;  %v746_v14 = vmul.f32 2.0, %v490_v6  ;;  %v747_v15 = vmul.f32 2.0, %v491_v7 }
  0x8b   : > { %1256 = vst [vmem:[%s1823_s17 + $0x2f0] sm:$0xff] %v1000_v5  ;;  %v748_v16 = vmul.f32 2.0, %v492_v8  ;;  %v496_v17 = vmax.f32 %v240_v4, 0.0  ;;  %v242_v18 = vld [vmem:[%s1800_s30 + $0x340] sm:$0xff]  ;;  %v243_v19 = vld [vmem:[%s1800_s30 + $0x348] sm:$0xff]  ;;  %1257 = vst [vmem:[%s1823_s17 + $0x2f8] sm:$0xff] %v1001_v10 }
  0x8c   : > { %v749_v20 = vmul.f32 2.0, %v493_v11  ;;  %v750_v21 = vmul.f32 2.0, %v494_v12  ;;  %v751_v22 = vmul.f32 2.0, %v495_v13  ;;  %v497_v23 = vmax.f32 %v241_v9, 0.0  ;;  %v244_v24 = vld [vmem:[%s1800_s30 + $0x350] sm:$0xff]  ;;  %v245_v25 = vld [vmem:[%s1800_s30 + $0x358] sm:$0xff] }
  0x8d   : > { %v1002_v26 = vadd.f32 0.5, %v746_v14  ;;  %v1003_v27 = vadd.f32 0.5, %v747_v15  ;;  %v1004_v28 = vadd.f32 0.5, %v748_v16  ;;  %v752_v29 = vmul.f32 2.0, %v496_v17  ;;  %v246_v30 = vld [vmem:[%s1800_s30 + $0x360] sm:$0xff]  ;;  %v247_v31 = vld [vmem:[%s1800_s30 + $0x368] sm:$0xff] }
  0x8e   : > { %v1005_v32 = vadd.f32 0.5, %v749_v20  ;;  %v1006_v33 = vadd.f32 0.5, %v750_v21  ;;  %v1007_v34 = vadd.f32 0.5, %v751_v22  ;;  %v753_v35 = vmul.f32 2.0, %v497_v23  ;;  %v248_v36 = vld [vmem:[%s1800_s30 + $0x370] sm:$0xff]  ;;  %v249_v41 = vld [vmem:[%s1800_s30 + $0x378] sm:$0xff] }
  0x8f   : > { %1258 = vst [vmem:[%s1823_s17 + $0x300] sm:$0xff] %v1002_v26  ;;  %1259 = vst [vmem:[%s1823_s17 + $0x308] sm:$0xff] %v1003_v27  ;;  %v1008_v37 = vadd.f32 0.5, %v752_v29  ;;  %v498_v38 = vmax.f32 %v242_v18, 0.0  ;;  %v499_v39 = vmax.f32 %v243_v19, 0.0  ;;  %v500_v40 = vmax.f32 %v244_v24, 0.0 }
  0x90   : > { %1260 = vst [vmem:[%s1823_s17 + $0x310] sm:$0xff] %v1004_v28  ;;  %1261 = vst [vmem:[%s1823_s17 + $0x318] sm:$0xff] %v1005_v32  ;;  %v1009_v42 = vadd.f32 0.5, %v753_v35  ;;  %v501_v43 = vmax.f32 %v245_v25, 0.0  ;;  %v502_v44 = vmax.f32 %v246_v30, 0.0  ;;  %v503_v45 = vmax.f32 %v247_v31, 0.0 }
  0x91   : > { %1262 = vst [vmem:[%s1823_s17 + $0x320] sm:$0xff] %v1006_v33  ;;  %1263 = vst [vmem:[%s1823_s17 + $0x328] sm:$0xff] %v1007_v34  ;;  %v754_v46 = vmul.f32 2.0, %v498_v38  ;;  %v755_v47 = vmul.f32 2.0, %v499_v39  ;;  %v756_v48 = vmul.f32 2.0, %v500_v40  ;;  %v504_v49 = vmax.f32 %v248_v36, 0.0 }
  0x92   : > { %1264 = vst [vmem:[%s1823_s17 + $0x330] sm:$0xff] %v1008_v37  ;;  %v250_v50 = vld [vmem:[%s1800_s30 + $0x380] sm:$0xff]  ;;  %v251_v51 = vld [vmem:[%s1800_s30 + $0x388] sm:$0xff]  ;;  %1265 = vst [vmem:[%s1823_s17 + $0x338] sm:$0xff] %v1009_v42  ;;  %v757_v52 = vmul.f32 2.0, %v501_v43  ;;  %v758_v53 = vmul.f32 2.0, %v502_v44 }
  0x93   : > { %v759_v54 = vmul.f32 2.0, %v503_v45  ;;  %v505_v55 = vmax.f32 %v249_v41, 0.0  ;;  %v252_v56 = vld [vmem:[%s1800_s30 + $0x390] sm:$0xff]  ;;  %v253_v57 = vld [vmem:[%s1800_s30 + $0x398] sm:$0xff]  ;;  %v1010_v58 = vadd.f32 0.5, %v754_v46  ;;  %v1011_v59 = vadd.f32 0.5, %v755_v47 }
  0x94   : > { %v1012_v60 = vadd.f32 0.5, %v756_v48  ;;  %v760_v61 = vmul.f32 2.0, %v504_v49  ;;  %v254_v62 = vld [vmem:[%s1800_s30 + $0x3a0] sm:$0xff]  ;;  %v255_v63 = vld [vmem:[%s1800_s30 + $0x3a8] sm:$0xff]  ;;  %v1013_v0 = vadd.f32 0.5, %v757_v52  ;;  %v1014_v1 = vadd.f32 0.5, %v758_v53 }
  0x95   : > { %v1015_v2 = vadd.f32 0.5, %v759_v54  ;;  %v761_v3 = vmul.f32 2.0, %v505_v55  ;;  %v256_v4 = vld [vmem:[%s1800_s30 + $0x3b0] sm:$0xff]  ;;  %1266 = vst [vmem:[%s1823_s17 + $0x340] sm:$0xff] %v1010_v58  ;;  %1267 = vst [vmem:[%s1823_s17 + $0x348] sm:$0xff] %v1011_v59  ;;  %v506_v6 = vmax.f32 %v250_v50, 0.0 }
  0x96   : > { %1268 = vst [vmem:[%s1823_s17 + $0x350] sm:$0xff] %v1012_v60  ;;  %v1016_v5 = vadd.f32 0.5, %v760_v61  ;;  %v507_v7 = vmax.f32 %v251_v51, 0.0  ;;  %v508_v8 = vmax.f32 %v252_v56, 0.0  ;;  %v257_v9 = vld [vmem:[%s1800_s30 + $0x3b8] sm:$0xff]  ;;  %1269 = vst [vmem:[%s1823_s17 + $0x358] sm:$0xff] %v1013_v0 }
  0x97   : > { %1270 = vst [vmem:[%s1823_s17 + $0x360] sm:$0xff] %v1014_v1  ;;  %1271 = vst [vmem:[%s1823_s17 + $0x368] sm:$0xff] %v1015_v2  ;;  %v1017_v10 = vadd.f32 0.5, %v761_v3  ;;  %v509_v11 = vmax.f32 %v253_v57, 0.0  ;;  %v510_v12 = vmax.f32 %v254_v62, 0.0  ;;  %v511_v13 = vmax.f32 %v255_v63, 0.0 }
  0x98   : > { %1272 = vst [vmem:[%s1823_s17 + $0x370] sm:$0xff] %v1016_v5  ;;  %v762_v14 = vmul.f32 2.0, %v506_v6  ;;  %v763_v15 = vmul.f32 2.0, %v507_v7  ;;  %v764_v16 = vmul.f32 2.0, %v508_v8  ;;  %v512_v17 = vmax.f32 %v256_v4, 0.0  ;;  %v258_v18 = vld [vmem:[%s1800_s30 + $0x3c0] sm:$0xff] }
  0x99   : > { %v259_v19 = vld [vmem:[%s1800_s30 + $0x3c8] sm:$0xff]  ;;  %1273 = vst [vmem:[%s1823_s17 + $0x378] sm:$0xff] %v1017_v10  ;;  %v765_v20 = vmul.f32 2.0, %v509_v11  ;;  %v766_v21 = vmul.f32 2.0, %v510_v12  ;;  %v767_v22 = vmul.f32 2.0, %v511_v13  ;;  %v513_v23 = vmax.f32 %v257_v9, 0.0 }
  0x9a   : > { %v260_v24 = vld [vmem:[%s1800_s30 + $0x3d0] sm:$0xff]  ;;  %v261_v25 = vld [vmem:[%s1800_s30 + $0x3d8] sm:$0xff]  ;;  %v1018_v26 = vadd.f32 0.5, %v762_v14  ;;  %v1019_v27 = vadd.f32 0.5, %v763_v15  ;;  %v1020_v28 = vadd.f32 0.5, %v764_v16  ;;  %v768_v29 = vmul.f32 2.0, %v512_v17 }
  0x9b   : > { %v262_v30 = vld [vmem:[%s1800_s30 + $0x3e0] sm:$0xff]  ;;  %v263_v31 = vld [vmem:[%s1800_s30 + $0x3e8] sm:$0xff]  ;;  %v1021_v32 = vadd.f32 0.5, %v765_v20  ;;  %v1022_v33 = vadd.f32 0.5, %v766_v21  ;;  %v1023_v34 = vadd.f32 0.5, %v767_v22  ;;  %v769_v35 = vmul.f32 2.0, %v513_v23 }
  0x9c   : > { %v264_v36 = vld [vmem:[%s1800_s30 + $0x3f0] sm:$0xff]  ;;  %1274 = vst [vmem:[%s1823_s17 + $0x380] sm:$0xff] %v1018_v26  ;;  %1275 = vst [vmem:[%s1823_s17 + $0x388] sm:$0xff] %v1019_v27  ;;  %v1024_v37 = vadd.f32 0.5, %v768_v29  ;;  %v514_v38 = vmax.f32 %v258_v18, 0.0  ;;  %v515_v39 = vmax.f32 %v259_v19, 0.0 }
  0x9d   : > { %1276 = vst [vmem:[%s1823_s17 + $0x390] sm:$0xff] %v1020_v28  ;;  %v516_v40 = vmax.f32 %v260_v24, 0.0  ;;  %v265_v41 = vld [vmem:[%s1800_s30 + $0x3f8] sm:$0xff]  ;;  %1277 = vst [vmem:[%s1823_s17 + $0x398] sm:$0xff] %v1021_v32  ;;  %v1025_v42 = vadd.f32 0.5, %v769_v35  ;;  %v517_v43 = vmax.f32 %v261_v25, 0.0 }
  0x9e   : > { %1278 = vst [vmem:[%s1823_s17 + $0x3a0] sm:$0xff] %v1022_v33  ;;  %1279 = vst [vmem:[%s1823_s17 + $0x3a8] sm:$0xff] %v1023_v34  ;;  %v518_v44 = vmax.f32 %v262_v30, 0.0  ;;  %v519_v45 = vmax.f32 %v263_v31, 0.0  ;;  %v770_v46 = vmul.f32 2.0, %v514_v38  ;;  %v771_v47 = vmul.f32 2.0, %v515_v39 }
  0x9f   : > { %1280 = vst [vmem:[%s1823_s17 + $0x3b0] sm:$0xff] %v1024_v37  ;;  %v772_v48 = vmul.f32 2.0, %v516_v40  ;;  %v520_v49 = vmax.f32 %v264_v36, 0.0  ;;  %v266_v50 = vld [vmem:[%s1800_s30 + $0x400] sm:$0xff]  ;;  %v267_v51 = vld [vmem:[%s1800_s30 + $0x408] sm:$0xff]  ;;  %1281 = vst [vmem:[%s1823_s17 + $0x3b8] sm:$0xff] %v1025_v42 }
  0xa0   : > { %v773_v52 = vmul.f32 2.0, %v517_v43  ;;  %v774_v53 = vmul.f32 2.0, %v518_v44  ;;  %v775_v54 = vmul.f32 2.0, %v519_v45  ;;  %v521_v55 = vmax.f32 %v265_v41, 0.0  ;;  %v268_v56 = vld [vmem:[%s1800_s30 + $0x410] sm:$0xff]  ;;  %v269_v57 = vld [vmem:[%s1800_s30 + $0x418] sm:$0xff] }
  0xa1   : > { %v1026_v58 = vadd.f32 0.5, %v770_v46  ;;  %v1027_v59 = vadd.f32 0.5, %v771_v47  ;;  %v1028_v60 = vadd.f32 0.5, %v772_v48  ;;  %v776_v61 = vmul.f32 2.0, %v520_v49  ;;  %v270_v62 = vld [vmem:[%s1800_s30 + $0x420] sm:$0xff]  ;;  %v271_v63 = vld [vmem:[%s1800_s30 + $0x428] sm:$0xff] }
  0xa2   : > { %v1029_v0 = vadd.f32 0.5, %v773_v52  ;;  %v1030_v1 = vadd.f32 0.5, %v774_v53  ;;  %v1031_v2 = vadd.f32 0.5, %v775_v54  ;;  %v777_v3 = vmul.f32 2.0, %v521_v55  ;;  %v272_v4 = vld [vmem:[%s1800_s30 + $0x430] sm:$0xff]  ;;  %v273_v9 = vld [vmem:[%s1800_s30 + $0x438] sm:$0xff] }
  0xa3   : > { %1282 = vst [vmem:[%s1823_s17 + $0x3c0] sm:$0xff] %v1026_v58  ;;  %1283 = vst [vmem:[%s1823_s17 + $0x3c8] sm:$0xff] %v1027_v59  ;;  %v1032_v5 = vadd.f32 0.5, %v776_v61  ;;  %v522_v6 = vmax.f32 %v266_v50, 0.0  ;;  %v523_v7 = vmax.f32 %v267_v51, 0.0  ;;  %v524_v8 = vmax.f32 %v268_v56, 0.0 }
  0xa4   : > { %1284 = vst [vmem:[%s1823_s17 + $0x3d0] sm:$0xff] %v1028_v60  ;;  %1285 = vst [vmem:[%s1823_s17 + $0x3d8] sm:$0xff] %v1029_v0  ;;  %v1033_v10 = vadd.f32 0.5, %v777_v3  ;;  %v525_v11 = vmax.f32 %v269_v57, 0.0  ;;  %v526_v12 = vmax.f32 %v270_v62, 0.0  ;;  %v527_v13 = vmax.f32 %v271_v63, 0.0 }
  0xa5   : > { %1286 = vst [vmem:[%s1823_s17 + $0x3e0] sm:$0xff] %v1030_v1  ;;  %1287 = vst [vmem:[%s1823_s17 + $0x3e8] sm:$0xff] %v1031_v2  ;;  %v778_v14 = vmul.f32 2.0, %v522_v6  ;;  %v779_v15 = vmul.f32 2.0, %v523_v7  ;;  %v780_v16 = vmul.f32 2.0, %v524_v8  ;;  %v528_v17 = vmax.f32 %v272_v4, 0.0 }
  0xa6   : > { %1288 = vst [vmem:[%s1823_s17 + $0x3f0] sm:$0xff] %v1032_v5  ;;  %v274_v18 = vld [vmem:[%s1800_s30 + $0x440] sm:$0xff]  ;;  %v275_v19 = vld [vmem:[%s1800_s30 + $0x448] sm:$0xff]  ;;  %1289 = vst [vmem:[%s1823_s17 + $0x3f8] sm:$0xff] %v1033_v10  ;;  %v781_v20 = vmul.f32 2.0, %v525_v11  ;;  %v782_v21 = vmul.f32 2.0, %v526_v12 }
  0xa7   : > { %v783_v22 = vmul.f32 2.0, %v527_v13  ;;  %v529_v23 = vmax.f32 %v273_v9, 0.0  ;;  %v276_v24 = vld [vmem:[%s1800_s30 + $0x450] sm:$0xff]  ;;  %v277_v25 = vld [vmem:[%s1800_s30 + $0x458] sm:$0xff]  ;;  %v1034_v26 = vadd.f32 0.5, %v778_v14  ;;  %v1035_v27 = vadd.f32 0.5, %v779_v15 }
  0xa8   : > { %v1036_v28 = vadd.f32 0.5, %v780_v16  ;;  %v784_v29 = vmul.f32 2.0, %v528_v17  ;;  %v278_v30 = vld [vmem:[%s1800_s30 + $0x460] sm:$0xff]  ;;  %v279_v31 = vld [vmem:[%s1800_s30 + $0x468] sm:$0xff]  ;;  %v1037_v32 = vadd.f32 0.5, %v781_v20  ;;  %v1038_v33 = vadd.f32 0.5, %v782_v21 }
  0xa9   : > { %v1039_v34 = vadd.f32 0.5, %v783_v22  ;;  %v785_v35 = vmul.f32 2.0, %v529_v23  ;;  %v280_v36 = vld [vmem:[%s1800_s30 + $0x470] sm:$0xff]  ;;  %1290 = vst [vmem:[%s1823_s17 + $0x400] sm:$0xff] %v1034_v26  ;;  %1291 = vst [vmem:[%s1823_s17 + $0x408] sm:$0xff] %v1035_v27  ;;  %v530_v38 = vmax.f32 %v274_v18, 0.0 }
  0xaa   : > { %1292 = vst [vmem:[%s1823_s17 + $0x410] sm:$0xff] %v1036_v28  ;;  %v1040_v37 = vadd.f32 0.5, %v784_v29  ;;  %v531_v39 = vmax.f32 %v275_v19, 0.0  ;;  %v532_v40 = vmax.f32 %v276_v24, 0.0  ;;  %v281_v41 = vld [vmem:[%s1800_s30 + $0x478] sm:$0xff]  ;;  %1293 = vst [vmem:[%s1823_s17 + $0x418] sm:$0xff] %v1037_v32 }
  0xab   : > { %1294 = vst [vmem:[%s1823_s17 + $0x420] sm:$0xff] %v1038_v33  ;;  %1295 = vst [vmem:[%s1823_s17 + $0x428] sm:$0xff] %v1039_v34  ;;  %v1041_v42 = vadd.f32 0.5, %v785_v35  ;;  %v533_v43 = vmax.f32 %v277_v25, 0.0  ;;  %v534_v44 = vmax.f32 %v278_v30, 0.0  ;;  %v535_v45 = vmax.f32 %v279_v31, 0.0 }
  0xac   : > { %1296 = vst [vmem:[%s1823_s17 + $0x430] sm:$0xff] %v1040_v37  ;;  %v786_v46 = vmul.f32 2.0, %v530_v38  ;;  %v787_v47 = vmul.f32 2.0, %v531_v39  ;;  %v788_v48 = vmul.f32 2.0, %v532_v40  ;;  %v536_v49 = vmax.f32 %v280_v36, 0.0  ;;  %v282_v50 = vld [vmem:[%s1800_s30 + $0x480] sm:$0xff] }
  0xad   : > { %v283_v51 = vld [vmem:[%s1800_s30 + $0x488] sm:$0xff]  ;;  %1297 = vst [vmem:[%s1823_s17 + $0x438] sm:$0xff] %v1041_v42  ;;  %v789_v52 = vmul.f32 2.0, %v533_v43  ;;  %v790_v53 = vmul.f32 2.0, %v534_v44  ;;  %v791_v54 = vmul.f32 2.0, %v535_v45  ;;  %v537_v55 = vmax.f32 %v281_v41, 0.0 }
  0xae   : > { %v284_v56 = vld [vmem:[%s1800_s30 + $0x490] sm:$0xff]  ;;  %v285_v57 = vld [vmem:[%s1800_s30 + $0x498] sm:$0xff]  ;;  %v1042_v58 = vadd.f32 0.5, %v786_v46  ;;  %v1043_v59 = vadd.f32 0.5, %v787_v47  ;;  %v1044_v60 = vadd.f32 0.5, %v788_v48  ;;  %v792_v61 = vmul.f32 2.0, %v536_v49 }
  0xaf   : > { %v286_v62 = vld [vmem:[%s1800_s30 + $0x4a0] sm:$0xff]  ;;  %v287_v63 = vld [vmem:[%s1800_s30 + $0x4a8] sm:$0xff]  ;;  %v1045_v0 = vadd.f32 0.5, %v789_v52  ;;  %v1046_v1 = vadd.f32 0.5, %v790_v53  ;;  %v1047_v2 = vadd.f32 0.5, %v791_v54  ;;  %v793_v3 = vmul.f32 2.0, %v537_v55 }
  0xb0   : > { %v288_v4 = vld [vmem:[%s1800_s30 + $0x4b0] sm:$0xff]  ;;  %1298 = vst [vmem:[%s1823_s17 + $0x440] sm:$0xff] %v1042_v58  ;;  %1299 = vst [vmem:[%s1823_s17 + $0x448] sm:$0xff] %v1043_v59  ;;  %v1048_v5 = vadd.f32 0.5, %v792_v61  ;;  %v538_v6 = vmax.f32 %v282_v50, 0.0  ;;  %v539_v7 = vmax.f32 %v283_v51, 0.0 }
  0xb1   : > { %1300 = vst [vmem:[%s1823_s17 + $0x450] sm:$0xff] %v1044_v60  ;;  %v540_v8 = vmax.f32 %v284_v56, 0.0  ;;  %v289_v9 = vld [vmem:[%s1800_s30 + $0x4b8] sm:$0xff]  ;;  %1301 = vst [vmem:[%s1823_s17 + $0x458] sm:$0xff] %v1045_v0  ;;  %v1049_v10 = vadd.f32 0.5, %v793_v3  ;;  %v541_v11 = vmax.f32 %v285_v57, 0.0 }
  0xb2   : > { %1302 = vst [vmem:[%s1823_s17 + $0x460] sm:$0xff] %v1046_v1  ;;  %1303 = vst [vmem:[%s1823_s17 + $0x468] sm:$0xff] %v1047_v2  ;;  %v542_v12 = vmax.f32 %v286_v62, 0.0  ;;  %v543_v13 = vmax.f32 %v287_v63, 0.0  ;;  %v794_v14 = vmul.f32 2.0, %v538_v6  ;;  %v795_v15 = vmul.f32 2.0, %v539_v7 }
  0xb3   : > { %1304 = vst [vmem:[%s1823_s17 + $0x470] sm:$0xff] %v1048_v5  ;;  %v796_v16 = vmul.f32 2.0, %v540_v8  ;;  %v544_v17 = vmax.f32 %v288_v4, 0.0  ;;  %v290_v18 = vld [vmem:[%s1800_s30 + $0x4c0] sm:$0xff]  ;;  %v291_v19 = vld [vmem:[%s1800_s30 + $0x4c8] sm:$0xff]  ;;  %1305 = vst [vmem:[%s1823_s17 + $0x478] sm:$0xff] %v1049_v10 }
  0xb4   : > { %v797_v20 = vmul.f32 2.0, %v541_v11  ;;  %v798_v21 = vmul.f32 2.0, %v542_v12  ;;  %v799_v22 = vmul.f32 2.0, %v543_v13  ;;  %v545_v23 = vmax.f32 %v289_v9, 0.0  ;;  %v292_v24 = vld [vmem:[%s1800_s30 + $0x4d0] sm:$0xff]  ;;  %v293_v25 = vld [vmem:[%s1800_s30 + $0x4d8] sm:$0xff] }
  0xb5   : > { %v1050_v26 = vadd.f32 0.5, %v794_v14  ;;  %v1051_v27 = vadd.f32 0.5, %v795_v15  ;;  %v1052_v28 = vadd.f32 0.5, %v796_v16  ;;  %v800_v29 = vmul.f32 2.0, %v544_v17  ;;  %v294_v30 = vld [vmem:[%s1800_s30 + $0x4e0] sm:$0xff]  ;;  %v295_v31 = vld [vmem:[%s1800_s30 + $0x4e8] sm:$0xff] }
  0xb6   : > { %v1053_v32 = vadd.f32 0.5, %v797_v20  ;;  %v1054_v33 = vadd.f32 0.5, %v798_v21  ;;  %v1055_v34 = vadd.f32 0.5, %v799_v22  ;;  %v801_v35 = vmul.f32 2.0, %v545_v23  ;;  %v296_v36 = vld [vmem:[%s1800_s30 + $0x4f0] sm:$0xff]  ;;  %v297_v41 = vld [vmem:[%s1800_s30 + $0x4f8] sm:$0xff] }
  0xb7   : > { %1306 = vst [vmem:[%s1823_s17 + $0x480] sm:$0xff] %v1050_v26  ;;  %1307 = vst [vmem:[%s1823_s17 + $0x488] sm:$0xff] %v1051_v27  ;;  %v1056_v37 = vadd.f32 0.5, %v800_v29  ;;  %v546_v38 = vmax.f32 %v290_v18, 0.0  ;;  %v547_v39 = vmax.f32 %v291_v19, 0.0  ;;  %v548_v40 = vmax.f32 %v292_v24, 0.0 }
  0xb8   : > { %1308 = vst [vmem:[%s1823_s17 + $0x490] sm:$0xff] %v1052_v28  ;;  %1309 = vst [vmem:[%s1823_s17 + $0x498] sm:$0xff] %v1053_v32  ;;  %v1057_v42 = vadd.f32 0.5, %v801_v35  ;;  %v549_v43 = vmax.f32 %v293_v25, 0.0  ;;  %v550_v44 = vmax.f32 %v294_v30, 0.0  ;;  %v551_v45 = vmax.f32 %v295_v31, 0.0 }
  0xb9   : > { %1310 = vst [vmem:[%s1823_s17 + $0x4a0] sm:$0xff] %v1054_v33  ;;  %1311 = vst [vmem:[%s1823_s17 + $0x4a8] sm:$0xff] %v1055_v34  ;;  %v802_v46 = vmul.f32 2.0, %v546_v38  ;;  %v803_v47 = vmul.f32 2.0, %v547_v39  ;;  %v804_v48 = vmul.f32 2.0, %v548_v40  ;;  %v552_v49 = vmax.f32 %v296_v36, 0.0 }
  0xba   : > { %1312 = vst [vmem:[%s1823_s17 + $0x4b0] sm:$0xff] %v1056_v37  ;;  %v298_v50 = vld [vmem:[%s1800_s30 + $0x500] sm:$0xff]  ;;  %v299_v51 = vld [vmem:[%s1800_s30 + $0x508] sm:$0xff]  ;;  %1313 = vst [vmem:[%s1823_s17 + $0x4b8] sm:$0xff] %v1057_v42  ;;  %v805_v52 = vmul.f32 2.0, %v549_v43  ;;  %v806_v53 = vmul.f32 2.0, %v550_v44 }
  0xbb   : > { %v807_v54 = vmul.f32 2.0, %v551_v45  ;;  %v553_v55 = vmax.f32 %v297_v41, 0.0  ;;  %v300_v56 = vld [vmem:[%s1800_s30 + $0x510] sm:$0xff]  ;;  %v301_v57 = vld [vmem:[%s1800_s30 + $0x518] sm:$0xff]  ;;  %v1058_v58 = vadd.f32 0.5, %v802_v46  ;;  %v1059_v59 = vadd.f32 0.5, %v803_v47 }
  0xbc   : > { %v1060_v60 = vadd.f32 0.5, %v804_v48  ;;  %v808_v61 = vmul.f32 2.0, %v552_v49  ;;  %v302_v62 = vld [vmem:[%s1800_s30 + $0x520] sm:$0xff]  ;;  %v303_v63 = vld [vmem:[%s1800_s30 + $0x528] sm:$0xff]  ;;  %v1061_v0 = vadd.f32 0.5, %v805_v52  ;;  %v1062_v1 = vadd.f32 0.5, %v806_v53 }
  0xbd   : > { %v1063_v2 = vadd.f32 0.5, %v807_v54  ;;  %v809_v3 = vmul.f32 2.0, %v553_v55  ;;  %v304_v4 = vld [vmem:[%s1800_s30 + $0x530] sm:$0xff]  ;;  %1314 = vst [vmem:[%s1823_s17 + $0x4c0] sm:$0xff] %v1058_v58  ;;  %1315 = vst [vmem:[%s1823_s17 + $0x4c8] sm:$0xff] %v1059_v59  ;;  %v554_v6 = vmax.f32 %v298_v50, 0.0 }
  0xbe   : > { %1316 = vst [vmem:[%s1823_s17 + $0x4d0] sm:$0xff] %v1060_v60  ;;  %v1064_v5 = vadd.f32 0.5, %v808_v61  ;;  %v555_v7 = vmax.f32 %v299_v51, 0.0  ;;  %v556_v8 = vmax.f32 %v300_v56, 0.0  ;;  %v305_v9 = vld [vmem:[%s1800_s30 + $0x538] sm:$0xff]  ;;  %1317 = vst [vmem:[%s1823_s17 + $0x4d8] sm:$0xff] %v1061_v0 }
  0xbf   : > { %1318 = vst [vmem:[%s1823_s17 + $0x4e0] sm:$0xff] %v1062_v1  ;;  %1319 = vst [vmem:[%s1823_s17 + $0x4e8] sm:$0xff] %v1063_v2  ;;  %v1065_v10 = vadd.f32 0.5, %v809_v3  ;;  %v557_v11 = vmax.f32 %v301_v57, 0.0  ;;  %v558_v12 = vmax.f32 %v302_v62, 0.0  ;;  %v559_v13 = vmax.f32 %v303_v63, 0.0 }
  0xc0   : > { %1320 = vst [vmem:[%s1823_s17 + $0x4f0] sm:$0xff] %v1064_v5  ;;  %v810_v14 = vmul.f32 2.0, %v554_v6  ;;  %v811_v15 = vmul.f32 2.0, %v555_v7  ;;  %v812_v16 = vmul.f32 2.0, %v556_v8  ;;  %v560_v17 = vmax.f32 %v304_v4, 0.0  ;;  %v306_v18 = vld [vmem:[%s1800_s30 + $0x540] sm:$0xff] }
  0xc1   : > { %v307_v19 = vld [vmem:[%s1800_s30 + $0x548] sm:$0xff]  ;;  %1321 = vst [vmem:[%s1823_s17 + $0x4f8] sm:$0xff] %v1065_v10  ;;  %v813_v20 = vmul.f32 2.0, %v557_v11  ;;  %v814_v21 = vmul.f32 2.0, %v558_v12  ;;  %v815_v22 = vmul.f32 2.0, %v559_v13  ;;  %v561_v23 = vmax.f32 %v305_v9, 0.0 }
  0xc2   : > { %v308_v24 = vld [vmem:[%s1800_s30 + $0x550] sm:$0xff]  ;;  %v309_v25 = vld [vmem:[%s1800_s30 + $0x558] sm:$0xff]  ;;  %v1066_v26 = vadd.f32 0.5, %v810_v14  ;;  %v1067_v27 = vadd.f32 0.5, %v811_v15  ;;  %v1068_v28 = vadd.f32 0.5, %v812_v16  ;;  %v816_v29 = vmul.f32 2.0, %v560_v17 }
  0xc3   : > { %v310_v30 = vld [vmem:[%s1800_s30 + $0x560] sm:$0xff]  ;;  %v311_v31 = vld [vmem:[%s1800_s30 + $0x568] sm:$0xff]  ;;  %v1069_v32 = vadd.f32 0.5, %v813_v20  ;;  %v1070_v33 = vadd.f32 0.5, %v814_v21  ;;  %v1071_v34 = vadd.f32 0.5, %v815_v22  ;;  %v817_v35 = vmul.f32 2.0, %v561_v23 }
  0xc4   : > { %v312_v36 = vld [vmem:[%s1800_s30 + $0x570] sm:$0xff]  ;;  %1322 = vst [vmem:[%s1823_s17 + $0x500] sm:$0xff] %v1066_v26  ;;  %1323 = vst [vmem:[%s1823_s17 + $0x508] sm:$0xff] %v1067_v27  ;;  %v1072_v37 = vadd.f32 0.5, %v816_v29  ;;  %v562_v38 = vmax.f32 %v306_v18, 0.0  ;;  %v563_v39 = vmax.f32 %v307_v19, 0.0 }
  0xc5   : > { %1324 = vst [vmem:[%s1823_s17 + $0x510] sm:$0xff] %v1068_v28  ;;  %v564_v40 = vmax.f32 %v308_v24, 0.0  ;;  %v313_v41 = vld [vmem:[%s1800_s30 + $0x578] sm:$0xff]  ;;  %1325 = vst [vmem:[%s1823_s17 + $0x518] sm:$0xff] %v1069_v32  ;;  %v1073_v42 = vadd.f32 0.5, %v817_v35  ;;  %v565_v43 = vmax.f32 %v309_v25, 0.0 }
  0xc6   : > { %1326 = vst [vmem:[%s1823_s17 + $0x520] sm:$0xff] %v1070_v33  ;;  %1327 = vst [vmem:[%s1823_s17 + $0x528] sm:$0xff] %v1071_v34  ;;  %v566_v44 = vmax.f32 %v310_v30, 0.0  ;;  %v567_v45 = vmax.f32 %v311_v31, 0.0  ;;  %v818_v46 = vmul.f32 2.0, %v562_v38  ;;  %v819_v47 = vmul.f32 2.0, %v563_v39 }
  0xc7   : > { %1328 = vst [vmem:[%s1823_s17 + $0x530] sm:$0xff] %v1072_v37  ;;  %v820_v48 = vmul.f32 2.0, %v564_v40  ;;  %v568_v49 = vmax.f32 %v312_v36, 0.0  ;;  %v314_v50 = vld [vmem:[%s1800_s30 + $0x580] sm:$0xff]  ;;  %v315_v51 = vld [vmem:[%s1800_s30 + $0x588] sm:$0xff]  ;;  %1329 = vst [vmem:[%s1823_s17 + $0x538] sm:$0xff] %v1073_v42 }
  0xc8   : > { %v821_v52 = vmul.f32 2.0, %v565_v43  ;;  %v822_v53 = vmul.f32 2.0, %v566_v44  ;;  %v823_v54 = vmul.f32 2.0, %v567_v45  ;;  %v569_v55 = vmax.f32 %v313_v41, 0.0  ;;  %v316_v56 = vld [vmem:[%s1800_s30 + $0x590] sm:$0xff]  ;;  %v317_v57 = vld [vmem:[%s1800_s30 + $0x598] sm:$0xff] }
  0xc9   : > { %v1074_v58 = vadd.f32 0.5, %v818_v46  ;;  %v1075_v59 = vadd.f32 0.5, %v819_v47  ;;  %v1076_v60 = vadd.f32 0.5, %v820_v48  ;;  %v824_v61 = vmul.f32 2.0, %v568_v49  ;;  %v318_v62 = vld [vmem:[%s1800_s30 + $0x5a0] sm:$0xff]  ;;  %v319_v63 = vld [vmem:[%s1800_s30 + $0x5a8] sm:$0xff] }
  0xca   : > { %v1077_v0 = vadd.f32 0.5, %v821_v52  ;;  %v1078_v1 = vadd.f32 0.5, %v822_v53  ;;  %v1079_v2 = vadd.f32 0.5, %v823_v54  ;;  %v825_v3 = vmul.f32 2.0, %v569_v55  ;;  %v320_v4 = vld [vmem:[%s1800_s30 + $0x5b0] sm:$0xff]  ;;  %v321_v9 = vld [vmem:[%s1800_s30 + $0x5b8] sm:$0xff] }
  0xcb   : > { %1330 = vst [vmem:[%s1823_s17 + $0x540] sm:$0xff] %v1074_v58  ;;  %1331 = vst [vmem:[%s1823_s17 + $0x548] sm:$0xff] %v1075_v59  ;;  %v1080_v5 = vadd.f32 0.5, %v824_v61  ;;  %v570_v6 = vmax.f32 %v314_v50, 0.0  ;;  %v571_v7 = vmax.f32 %v315_v51, 0.0  ;;  %v572_v8 = vmax.f32 %v316_v56, 0.0 }
  0xcc   : > { %1332 = vst [vmem:[%s1823_s17 + $0x550] sm:$0xff] %v1076_v60  ;;  %1333 = vst [vmem:[%s1823_s17 + $0x558] sm:$0xff] %v1077_v0  ;;  %v1081_v10 = vadd.f32 0.5, %v825_v3  ;;  %v573_v11 = vmax.f32 %v317_v57, 0.0  ;;  %v574_v12 = vmax.f32 %v318_v62, 0.0  ;;  %v575_v13 = vmax.f32 %v319_v63, 0.0 }
  0xcd   : > { %1334 = vst [vmem:[%s1823_s17 + $0x560] sm:$0xff] %v1078_v1  ;;  %1335 = vst [vmem:[%s1823_s17 + $0x568] sm:$0xff] %v1079_v2  ;;  %v826_v14 = vmul.f32 2.0, %v570_v6  ;;  %v827_v15 = vmul.f32 2.0, %v571_v7  ;;  %v828_v16 = vmul.f32 2.0, %v572_v8  ;;  %v576_v17 = vmax.f32 %v320_v4, 0.0 }
  0xce   : > { %1336 = vst [vmem:[%s1823_s17 + $0x570] sm:$0xff] %v1080_v5  ;;  %v322_v18 = vld [vmem:[%s1800_s30 + $0x5c0] sm:$0xff]  ;;  %v323_v19 = vld [vmem:[%s1800_s30 + $0x5c8] sm:$0xff]  ;;  %1337 = vst [vmem:[%s1823_s17 + $0x578] sm:$0xff] %v1081_v10  ;;  %v829_v20 = vmul.f32 2.0, %v573_v11  ;;  %v830_v21 = vmul.f32 2.0, %v574_v12 }
  0xcf   : > { %v831_v22 = vmul.f32 2.0, %v575_v13  ;;  %v577_v23 = vmax.f32 %v321_v9, 0.0  ;;  %v324_v24 = vld [vmem:[%s1800_s30 + $0x5d0] sm:$0xff]  ;;  %v325_v25 = vld [vmem:[%s1800_s30 + $0x5d8] sm:$0xff]  ;;  %v1082_v26 = vadd.f32 0.5, %v826_v14  ;;  %v1083_v27 = vadd.f32 0.5, %v827_v15 }
  0xd0   : > { %v1084_v28 = vadd.f32 0.5, %v828_v16  ;;  %v832_v29 = vmul.f32 2.0, %v576_v17  ;;  %v326_v30 = vld [vmem:[%s1800_s30 + $0x5e0] sm:$0xff]  ;;  %v327_v31 = vld [vmem:[%s1800_s30 + $0x5e8] sm:$0xff]  ;;  %v1085_v32 = vadd.f32 0.5, %v829_v20  ;;  %v1086_v33 = vadd.f32 0.5, %v830_v21 }
  0xd1   : > { %v1087_v34 = vadd.f32 0.5, %v831_v22  ;;  %v833_v35 = vmul.f32 2.0, %v577_v23  ;;  %v328_v36 = vld [vmem:[%s1800_s30 + $0x5f0] sm:$0xff]  ;;  %1338 = vst [vmem:[%s1823_s17 + $0x580] sm:$0xff] %v1082_v26  ;;  %1339 = vst [vmem:[%s1823_s17 + $0x588] sm:$0xff] %v1083_v27  ;;  %v578_v38 = vmax.f32 %v322_v18, 0.0 }
  0xd2   : > { %1340 = vst [vmem:[%s1823_s17 + $0x590] sm:$0xff] %v1084_v28  ;;  %v1088_v37 = vadd.f32 0.5, %v832_v29  ;;  %v579_v39 = vmax.f32 %v323_v19, 0.0  ;;  %v580_v40 = vmax.f32 %v324_v24, 0.0  ;;  %v329_v41 = vld [vmem:[%s1800_s30 + $0x5f8] sm:$0xff]  ;;  %1341 = vst [vmem:[%s1823_s17 + $0x598] sm:$0xff] %v1085_v32 }
  0xd3   : > { %1342 = vst [vmem:[%s1823_s17 + $0x5a0] sm:$0xff] %v1086_v33  ;;  %1343 = vst [vmem:[%s1823_s17 + $0x5a8] sm:$0xff] %v1087_v34  ;;  %v1089_v42 = vadd.f32 0.5, %v833_v35  ;;  %v581_v43 = vmax.f32 %v325_v25, 0.0  ;;  %v582_v44 = vmax.f32 %v326_v30, 0.0  ;;  %v583_v45 = vmax.f32 %v327_v31, 0.0 }
  0xd4   : > { %1344 = vst [vmem:[%s1823_s17 + $0x5b0] sm:$0xff] %v1088_v37  ;;  %v834_v46 = vmul.f32 2.0, %v578_v38  ;;  %v835_v47 = vmul.f32 2.0, %v579_v39  ;;  %v836_v48 = vmul.f32 2.0, %v580_v40  ;;  %v584_v49 = vmax.f32 %v328_v36, 0.0  ;;  %v330_v50 = vld [vmem:[%s1800_s30 + $0x600] sm:$0xff] }
  0xd5   : > { %v331_v51 = vld [vmem:[%s1800_s30 + $0x608] sm:$0xff]  ;;  %1345 = vst [vmem:[%s1823_s17 + $0x5b8] sm:$0xff] %v1089_v42  ;;  %v837_v52 = vmul.f32 2.0, %v581_v43  ;;  %v838_v53 = vmul.f32 2.0, %v582_v44  ;;  %v839_v54 = vmul.f32 2.0, %v583_v45  ;;  %v585_v55 = vmax.f32 %v329_v41, 0.0 }
  0xd6   : > { %v332_v56 = vld [vmem:[%s1800_s30 + $0x610] sm:$0xff]  ;;  %v333_v57 = vld [vmem:[%s1800_s30 + $0x618] sm:$0xff]  ;;  %v1090_v58 = vadd.f32 0.5, %v834_v46  ;;  %v1091_v59 = vadd.f32 0.5, %v835_v47  ;;  %v1092_v60 = vadd.f32 0.5, %v836_v48  ;;  %v840_v61 = vmul.f32 2.0, %v584_v49 }
  0xd7   : > { %v334_v62 = vld [vmem:[%s1800_s30 + $0x620] sm:$0xff]  ;;  %v335_v63 = vld [vmem:[%s1800_s30 + $0x628] sm:$0xff]  ;;  %v1093_v0 = vadd.f32 0.5, %v837_v52  ;;  %v1094_v1 = vadd.f32 0.5, %v838_v53  ;;  %v1095_v2 = vadd.f32 0.5, %v839_v54  ;;  %v841_v3 = vmul.f32 2.0, %v585_v55 }
  0xd8   : > { %v336_v4 = vld [vmem:[%s1800_s30 + $0x630] sm:$0xff]  ;;  %1346 = vst [vmem:[%s1823_s17 + $0x5c0] sm:$0xff] %v1090_v58  ;;  %1347 = vst [vmem:[%s1823_s17 + $0x5c8] sm:$0xff] %v1091_v59  ;;  %v1096_v5 = vadd.f32 0.5, %v840_v61  ;;  %v586_v6 = vmax.f32 %v330_v50, 0.0  ;;  %v587_v7 = vmax.f32 %v331_v51, 0.0 }
  0xd9   : > { %1348 = vst [vmem:[%s1823_s17 + $0x5d0] sm:$0xff] %v1092_v60  ;;  %v588_v8 = vmax.f32 %v332_v56, 0.0  ;;  %v337_v9 = vld [vmem:[%s1800_s30 + $0x638] sm:$0xff]  ;;  %1349 = vst [vmem:[%s1823_s17 + $0x5d8] sm:$0xff] %v1093_v0  ;;  %v1097_v10 = vadd.f32 0.5, %v841_v3  ;;  %v589_v11 = vmax.f32 %v333_v57, 0.0 }
  0xda   : > { %1350 = vst [vmem:[%s1823_s17 + $0x5e0] sm:$0xff] %v1094_v1  ;;  %1351 = vst [vmem:[%s1823_s17 + $0x5e8] sm:$0xff] %v1095_v2  ;;  %v590_v12 = vmax.f32 %v334_v62, 0.0  ;;  %v591_v13 = vmax.f32 %v335_v63, 0.0  ;;  %v842_v14 = vmul.f32 2.0, %v586_v6  ;;  %v843_v15 = vmul.f32 2.0, %v587_v7 }
  0xdb   : > { %1352 = vst [vmem:[%s1823_s17 + $0x5f0] sm:$0xff] %v1096_v5  ;;  %v844_v16 = vmul.f32 2.0, %v588_v8  ;;  %v592_v17 = vmax.f32 %v336_v4, 0.0  ;;  %v338_v18 = vld [vmem:[%s1800_s30 + $0x640] sm:$0xff]  ;;  %v339_v19 = vld [vmem:[%s1800_s30 + $0x648] sm:$0xff]  ;;  %1353 = vst [vmem:[%s1823_s17 + $0x5f8] sm:$0xff] %v1097_v10 }
  0xdc   : > { %v845_v20 = vmul.f32 2.0, %v589_v11  ;;  %v846_v21 = vmul.f32 2.0, %v590_v12  ;;  %v847_v22 = vmul.f32 2.0, %v591_v13  ;;  %v593_v23 = vmax.f32 %v337_v9, 0.0  ;;  %v340_v24 = vld [vmem:[%s1800_s30 + $0x650] sm:$0xff]  ;;  %v341_v25 = vld [vmem:[%s1800_s30 + $0x658] sm:$0xff] }
  0xdd   : > { %v1098_v26 = vadd.f32 0.5, %v842_v14  ;;  %v1099_v27 = vadd.f32 0.5, %v843_v15  ;;  %v1100_v28 = vadd.f32 0.5, %v844_v16  ;;  %v848_v29 = vmul.f32 2.0, %v592_v17  ;;  %v342_v30 = vld [vmem:[%s1800_s30 + $0x660] sm:$0xff]  ;;  %v343_v31 = vld [vmem:[%s1800_s30 + $0x668] sm:$0xff] }
  0xde   : > { %v1101_v32 = vadd.f32 0.5, %v845_v20  ;;  %v1102_v33 = vadd.f32 0.5, %v846_v21  ;;  %v1103_v34 = vadd.f32 0.5, %v847_v22  ;;  %v849_v35 = vmul.f32 2.0, %v593_v23  ;;  %v344_v36 = vld [vmem:[%s1800_s30 + $0x670] sm:$0xff]  ;;  %v345_v41 = vld [vmem:[%s1800_s30 + $0x678] sm:$0xff] }
  0xdf   : > { %1354 = vst [vmem:[%s1823_s17 + $0x600] sm:$0xff] %v1098_v26  ;;  %1355 = vst [vmem:[%s1823_s17 + $0x608] sm:$0xff] %v1099_v27  ;;  %v1104_v37 = vadd.f32 0.5, %v848_v29  ;;  %v594_v38 = vmax.f32 %v338_v18, 0.0  ;;  %v595_v39 = vmax.f32 %v339_v19, 0.0  ;;  %v596_v40 = vmax.f32 %v340_v24, 0.0 }
  0xe0   : > { %1356 = vst [vmem:[%s1823_s17 + $0x610] sm:$0xff] %v1100_v28  ;;  %1357 = vst [vmem:[%s1823_s17 + $0x618] sm:$0xff] %v1101_v32  ;;  %v1105_v42 = vadd.f32 0.5, %v849_v35  ;;  %v597_v43 = vmax.f32 %v341_v25, 0.0  ;;  %v598_v44 = vmax.f32 %v342_v30, 0.0  ;;  %v599_v45 = vmax.f32 %v343_v31, 0.0 }
  0xe1   : > { %1358 = vst [vmem:[%s1823_s17 + $0x620] sm:$0xff] %v1102_v33  ;;  %1359 = vst [vmem:[%s1823_s17 + $0x628] sm:$0xff] %v1103_v34  ;;  %v850_v46 = vmul.f32 2.0, %v594_v38  ;;  %v851_v47 = vmul.f32 2.0, %v595_v39  ;;  %v852_v48 = vmul.f32 2.0, %v596_v40  ;;  %v600_v49 = vmax.f32 %v344_v36, 0.0 }
  0xe2   : > { %1360 = vst [vmem:[%s1823_s17 + $0x630] sm:$0xff] %v1104_v37  ;;  %v346_v50 = vld [vmem:[%s1800_s30 + $0x680] sm:$0xff]  ;;  %v347_v51 = vld [vmem:[%s1800_s30 + $0x688] sm:$0xff]  ;;  %1361 = vst [vmem:[%s1823_s17 + $0x638] sm:$0xff] %v1105_v42  ;;  %v853_v52 = vmul.f32 2.0, %v597_v43  ;;  %v854_v53 = vmul.f32 2.0, %v598_v44 }
  0xe3   : > { %v855_v54 = vmul.f32 2.0, %v599_v45  ;;  %v601_v55 = vmax.f32 %v345_v41, 0.0  ;;  %v348_v56 = vld [vmem:[%s1800_s30 + $0x690] sm:$0xff]  ;;  %v349_v57 = vld [vmem:[%s1800_s30 + $0x698] sm:$0xff]  ;;  %v1106_v58 = vadd.f32 0.5, %v850_v46  ;;  %v1107_v59 = vadd.f32 0.5, %v851_v47 }
  0xe4   : > { %v1108_v60 = vadd.f32 0.5, %v852_v48  ;;  %v856_v61 = vmul.f32 2.0, %v600_v49  ;;  %v350_v62 = vld [vmem:[%s1800_s30 + $0x6a0] sm:$0xff]  ;;  %v351_v63 = vld [vmem:[%s1800_s30 + $0x6a8] sm:$0xff]  ;;  %v1109_v0 = vadd.f32 0.5, %v853_v52  ;;  %v1110_v1 = vadd.f32 0.5, %v854_v53 }
  0xe5   : > { %v1111_v2 = vadd.f32 0.5, %v855_v54  ;;  %v857_v3 = vmul.f32 2.0, %v601_v55  ;;  %v352_v4 = vld [vmem:[%s1800_s30 + $0x6b0] sm:$0xff]  ;;  %1362 = vst [vmem:[%s1823_s17 + $0x640] sm:$0xff] %v1106_v58  ;;  %1363 = vst [vmem:[%s1823_s17 + $0x648] sm:$0xff] %v1107_v59  ;;  %v602_v6 = vmax.f32 %v346_v50, 0.0 }
  0xe6   : > { %1364 = vst [vmem:[%s1823_s17 + $0x650] sm:$0xff] %v1108_v60  ;;  %v1112_v5 = vadd.f32 0.5, %v856_v61  ;;  %v603_v7 = vmax.f32 %v347_v51, 0.0  ;;  %v604_v8 = vmax.f32 %v348_v56, 0.0  ;;  %v353_v9 = vld [vmem:[%s1800_s30 + $0x6b8] sm:$0xff]  ;;  %1365 = vst [vmem:[%s1823_s17 + $0x658] sm:$0xff] %v1109_v0 }
  0xe7   : > { %1366 = vst [vmem:[%s1823_s17 + $0x660] sm:$0xff] %v1110_v1  ;;  %1367 = vst [vmem:[%s1823_s17 + $0x668] sm:$0xff] %v1111_v2  ;;  %v1113_v10 = vadd.f32 0.5, %v857_v3  ;;  %v605_v11 = vmax.f32 %v349_v57, 0.0  ;;  %v606_v12 = vmax.f32 %v350_v62, 0.0  ;;  %v607_v13 = vmax.f32 %v351_v63, 0.0 }
  0xe8   : > { %1368 = vst [vmem:[%s1823_s17 + $0x670] sm:$0xff] %v1112_v5  ;;  %v858_v14 = vmul.f32 2.0, %v602_v6  ;;  %v859_v15 = vmul.f32 2.0, %v603_v7  ;;  %v860_v16 = vmul.f32 2.0, %v604_v8  ;;  %v608_v17 = vmax.f32 %v352_v4, 0.0  ;;  %v354_v18 = vld [vmem:[%s1800_s30 + $0x6c0] sm:$0xff] }
  0xe9   : > { %v355_v19 = vld [vmem:[%s1800_s30 + $0x6c8] sm:$0xff]  ;;  %1369 = vst [vmem:[%s1823_s17 + $0x678] sm:$0xff] %v1113_v10  ;;  %v861_v20 = vmul.f32 2.0, %v605_v11  ;;  %v862_v21 = vmul.f32 2.0, %v606_v12  ;;  %v863_v22 = vmul.f32 2.0, %v607_v13  ;;  %v609_v23 = vmax.f32 %v353_v9, 0.0 }
  0xea   : > { %v356_v24 = vld [vmem:[%s1800_s30 + $0x6d0] sm:$0xff]  ;;  %v357_v25 = vld [vmem:[%s1800_s30 + $0x6d8] sm:$0xff]  ;;  %v1114_v26 = vadd.f32 0.5, %v858_v14  ;;  %v1115_v27 = vadd.f32 0.5, %v859_v15  ;;  %v1116_v28 = vadd.f32 0.5, %v860_v16  ;;  %v864_v29 = vmul.f32 2.0, %v608_v17 }
  0xeb   : > { %v358_v30 = vld [vmem:[%s1800_s30 + $0x6e0] sm:$0xff]  ;;  %v359_v31 = vld [vmem:[%s1800_s30 + $0x6e8] sm:$0xff]  ;;  %v1117_v32 = vadd.f32 0.5, %v861_v20  ;;  %v1118_v33 = vadd.f32 0.5, %v862_v21  ;;  %v1119_v34 = vadd.f32 0.5, %v863_v22  ;;  %v865_v35 = vmul.f32 2.0, %v609_v23 }
  0xec   : > { %v360_v36 = vld [vmem:[%s1800_s30 + $0x6f0] sm:$0xff]  ;;  %1370 = vst [vmem:[%s1823_s17 + $0x680] sm:$0xff] %v1114_v26  ;;  %1371 = vst [vmem:[%s1823_s17 + $0x688] sm:$0xff] %v1115_v27  ;;  %v1120_v37 = vadd.f32 0.5, %v864_v29  ;;  %v610_v38 = vmax.f32 %v354_v18, 0.0  ;;  %v611_v39 = vmax.f32 %v355_v19, 0.0 }
  0xed   : > { %1372 = vst [vmem:[%s1823_s17 + $0x690] sm:$0xff] %v1116_v28  ;;  %v612_v40 = vmax.f32 %v356_v24, 0.0  ;;  %v361_v41 = vld [vmem:[%s1800_s30 + $0x6f8] sm:$0xff]  ;;  %1373 = vst [vmem:[%s1823_s17 + $0x698] sm:$0xff] %v1117_v32  ;;  %v1121_v42 = vadd.f32 0.5, %v865_v35  ;;  %v613_v43 = vmax.f32 %v357_v25, 0.0 }
  0xee   : > { %1374 = vst [vmem:[%s1823_s17 + $0x6a0] sm:$0xff] %v1118_v33  ;;  %1375 = vst [vmem:[%s1823_s17 + $0x6a8] sm:$0xff] %v1119_v34  ;;  %v614_v44 = vmax.f32 %v358_v30, 0.0  ;;  %v615_v45 = vmax.f32 %v359_v31, 0.0  ;;  %v866_v46 = vmul.f32 2.0, %v610_v38  ;;  %v867_v47 = vmul.f32 2.0, %v611_v39 }
  0xef   : > { %1376 = vst [vmem:[%s1823_s17 + $0x6b0] sm:$0xff] %v1120_v37  ;;  %v868_v48 = vmul.f32 2.0, %v612_v40  ;;  %v616_v49 = vmax.f32 %v360_v36, 0.0  ;;  %v362_v50 = vld [vmem:[%s1800_s30 + $0x700] sm:$0xff]  ;;  %v363_v51 = vld [vmem:[%s1800_s30 + $0x708] sm:$0xff]  ;;  %1377 = vst [vmem:[%s1823_s17 + $0x6b8] sm:$0xff] %v1121_v42 }
  0xf0   : > { %v869_v52 = vmul.f32 2.0, %v613_v43  ;;  %v870_v53 = vmul.f32 2.0, %v614_v44  ;;  %v871_v54 = vmul.f32 2.0, %v615_v45  ;;  %v617_v55 = vmax.f32 %v361_v41, 0.0  ;;  %v364_v56 = vld [vmem:[%s1800_s30 + $0x710] sm:$0xff]  ;;  %v365_v57 = vld [vmem:[%s1800_s30 + $0x718] sm:$0xff] }
  0xf1   : > { %v1122_v58 = vadd.f32 0.5, %v866_v46  ;;  %v1123_v59 = vadd.f32 0.5, %v867_v47  ;;  %v1124_v60 = vadd.f32 0.5, %v868_v48  ;;  %v872_v61 = vmul.f32 2.0, %v616_v49  ;;  %v366_v62 = vld [vmem:[%s1800_s30 + $0x720] sm:$0xff]  ;;  %v367_v63 = vld [vmem:[%s1800_s30 + $0x728] sm:$0xff] }
  0xf2   : > { %v1125_v0 = vadd.f32 0.5, %v869_v52  ;;  %v1126_v1 = vadd.f32 0.5, %v870_v53  ;;  %v1127_v2 = vadd.f32 0.5, %v871_v54  ;;  %v873_v3 = vmul.f32 2.0, %v617_v55  ;;  %v368_v4 = vld [vmem:[%s1800_s30 + $0x730] sm:$0xff]  ;;  %v369_v9 = vld [vmem:[%s1800_s30 + $0x738] sm:$0xff] }
  0xf3   : > { %1378 = vst [vmem:[%s1823_s17 + $0x6c0] sm:$0xff] %v1122_v58  ;;  %1379 = vst [vmem:[%s1823_s17 + $0x6c8] sm:$0xff] %v1123_v59  ;;  %v1128_v5 = vadd.f32 0.5, %v872_v61  ;;  %v618_v6 = vmax.f32 %v362_v50, 0.0  ;;  %v619_v7 = vmax.f32 %v363_v51, 0.0  ;;  %v620_v8 = vmax.f32 %v364_v56, 0.0 }
  0xf4   : > { %1380 = vst [vmem:[%s1823_s17 + $0x6d0] sm:$0xff] %v1124_v60  ;;  %1381 = vst [vmem:[%s1823_s17 + $0x6d8] sm:$0xff] %v1125_v0  ;;  %v1129_v10 = vadd.f32 0.5, %v873_v3  ;;  %v621_v11 = vmax.f32 %v365_v57, 0.0  ;;  %v622_v12 = vmax.f32 %v366_v62, 0.0  ;;  %v623_v13 = vmax.f32 %v367_v63, 0.0 }
  0xf5   : > { %1382 = vst [vmem:[%s1823_s17 + $0x6e0] sm:$0xff] %v1126_v1  ;;  %1383 = vst [vmem:[%s1823_s17 + $0x6e8] sm:$0xff] %v1127_v2  ;;  %v874_v14 = vmul.f32 2.0, %v618_v6  ;;  %v875_v15 = vmul.f32 2.0, %v619_v7  ;;  %v876_v16 = vmul.f32 2.0, %v620_v8  ;;  %v624_v17 = vmax.f32 %v368_v4, 0.0 }
  0xf6   : > { %1384 = vst [vmem:[%s1823_s17 + $0x6f0] sm:$0xff] %v1128_v5  ;;  %v370_v18 = vld [vmem:[%s1800_s30 + $0x740] sm:$0xff]  ;;  %v371_v19 = vld [vmem:[%s1800_s30 + $0x748] sm:$0xff]  ;;  %1385 = vst [vmem:[%s1823_s17 + $0x6f8] sm:$0xff] %v1129_v10  ;;  %v877_v20 = vmul.f32 2.0, %v621_v11  ;;  %v878_v21 = vmul.f32 2.0, %v622_v12 }
  0xf7   : > { %v879_v22 = vmul.f32 2.0, %v623_v13  ;;  %v625_v23 = vmax.f32 %v369_v9, 0.0  ;;  %v372_v24 = vld [vmem:[%s1800_s30 + $0x750] sm:$0xff]  ;;  %v373_v25 = vld [vmem:[%s1800_s30 + $0x758] sm:$0xff]  ;;  %v1130_v26 = vadd.f32 0.5, %v874_v14  ;;  %v1131_v27 = vadd.f32 0.5, %v875_v15 }
  0xf8   : > { %v1132_v28 = vadd.f32 0.5, %v876_v16  ;;  %v880_v29 = vmul.f32 2.0, %v624_v17  ;;  %v374_v30 = vld [vmem:[%s1800_s30 + $0x760] sm:$0xff]  ;;  %v375_v31 = vld [vmem:[%s1800_s30 + $0x768] sm:$0xff]  ;;  %v1133_v32 = vadd.f32 0.5, %v877_v20  ;;  %v1134_v33 = vadd.f32 0.5, %v878_v21 }
  0xf9   : > { %v1135_v34 = vadd.f32 0.5, %v879_v22  ;;  %v881_v35 = vmul.f32 2.0, %v625_v23  ;;  %v376_v36 = vld [vmem:[%s1800_s30 + $0x770] sm:$0xff]  ;;  %1386 = vst [vmem:[%s1823_s17 + $0x700] sm:$0xff] %v1130_v26  ;;  %1387 = vst [vmem:[%s1823_s17 + $0x708] sm:$0xff] %v1131_v27  ;;  %v626_v38 = vmax.f32 %v370_v18, 0.0 }
  0xfa   : > { %1388 = vst [vmem:[%s1823_s17 + $0x710] sm:$0xff] %v1132_v28  ;;  %v1136_v37 = vadd.f32 0.5, %v880_v29  ;;  %v627_v39 = vmax.f32 %v371_v19, 0.0  ;;  %v628_v40 = vmax.f32 %v372_v24, 0.0  ;;  %v377_v41 = vld [vmem:[%s1800_s30 + $0x778] sm:$0xff]  ;;  %1389 = vst [vmem:[%s1823_s17 + $0x718] sm:$0xff] %v1133_v32 }
  0xfb   : > { %1390 = vst [vmem:[%s1823_s17 + $0x720] sm:$0xff] %v1134_v33  ;;  %1391 = vst [vmem:[%s1823_s17 + $0x728] sm:$0xff] %v1135_v34  ;;  %v1137_v42 = vadd.f32 0.5, %v881_v35  ;;  %v629_v43 = vmax.f32 %v373_v25, 0.0  ;;  %v630_v44 = vmax.f32 %v374_v30, 0.0  ;;  %v631_v45 = vmax.f32 %v375_v31, 0.0 }
  0xfc   : > { %1392 = vst [vmem:[%s1823_s17 + $0x730] sm:$0xff] %v1136_v37  ;;  %v882_v46 = vmul.f32 2.0, %v626_v38  ;;  %v883_v47 = vmul.f32 2.0, %v627_v39  ;;  %v884_v48 = vmul.f32 2.0, %v628_v40  ;;  %v632_v49 = vmax.f32 %v376_v36, 0.0  ;;  %v378_v50 = vld [vmem:[%s1800_s30 + $0x780] sm:$0xff] }
  0xfd   : > { %v379_v51 = vld [vmem:[%s1800_s30 + $0x788] sm:$0xff]  ;;  %1393 = vst [vmem:[%s1823_s17 + $0x738] sm:$0xff] %v1137_v42  ;;  %v885_v52 = vmul.f32 2.0, %v629_v43  ;;  %v886_v53 = vmul.f32 2.0, %v630_v44  ;;  %v887_v54 = vmul.f32 2.0, %v631_v45  ;;  %v633_v55 = vmax.f32 %v377_v41, 0.0 }
  0xfe   : > { %v380_v56 = vld [vmem:[%s1800_s30 + $0x790] sm:$0xff]  ;;  %v381_v57 = vld [vmem:[%s1800_s30 + $0x798] sm:$0xff]  ;;  %v1138_v58 = vadd.f32 0.5, %v882_v46  ;;  %v1139_v59 = vadd.f32 0.5, %v883_v47  ;;  %v1140_v60 = vadd.f32 0.5, %v884_v48  ;;  %v888_v61 = vmul.f32 2.0, %v632_v49 }
  0xff   : > { %v382_v62 = vld [vmem:[%s1800_s30 + $0x7a0] sm:$0xff]  ;;  %v383_v63 = vld [vmem:[%s1800_s30 + $0x7a8] sm:$0xff]  ;;  %v1141_v0 = vadd.f32 0.5, %v885_v52  ;;  %v1142_v1 = vadd.f32 0.5, %v886_v53  ;;  %v1143_v2 = vadd.f32 0.5, %v887_v54  ;;  %v889_v3 = vmul.f32 2.0, %v633_v55 }
 0x100   : > { %v384_v4 = vld [vmem:[%s1800_s30 + $0x7b0] sm:$0xff]  ;;  %1394 = vst [vmem:[%s1823_s17 + $0x740] sm:$0xff] %v1138_v58  ;;  %1395 = vst [vmem:[%s1823_s17 + $0x748] sm:$0xff] %v1139_v59  ;;  %v1144_v5 = vadd.f32 0.5, %v888_v61  ;;  %v634_v6 = vmax.f32 %v378_v50, 0.0  ;;  %v635_v7 = vmax.f32 %v379_v51, 0.0 }
 0x101   : > { %1396 = vst [vmem:[%s1823_s17 + $0x750] sm:$0xff] %v1140_v60  ;;  %v636_v8 = vmax.f32 %v380_v56, 0.0  ;;  %v385_v9 = vld [vmem:[%s1800_s30 + $0x7b8] sm:$0xff]  ;;  %1397 = vst [vmem:[%s1823_s17 + $0x758] sm:$0xff] %v1141_v0  ;;  %v1145_v10 = vadd.f32 0.5, %v889_v3  ;;  %v637_v11 = vmax.f32 %v381_v57, 0.0 }
 0x102   : > { %1398 = vst [vmem:[%s1823_s17 + $0x760] sm:$0xff] %v1142_v1  ;;  %1399 = vst [vmem:[%s1823_s17 + $0x768] sm:$0xff] %v1143_v2  ;;  %v638_v12 = vmax.f32 %v382_v62, 0.0  ;;  %v639_v13 = vmax.f32 %v383_v63, 0.0  ;;  %v890_v14 = vmul.f32 2.0, %v634_v6  ;;  %v891_v15 = vmul.f32 2.0, %v635_v7 }
 0x103   : > { %1400 = vst [vmem:[%s1823_s17 + $0x770] sm:$0xff] %v1144_v5  ;;  %v892_v16 = vmul.f32 2.0, %v636_v8  ;;  %v640_v17 = vmax.f32 %v384_v4, 0.0  ;;  %v386_v18 = vld [vmem:[%s1800_s30 + $0x7c0] sm:$0xff]  ;;  %v387_v19 = vld [vmem:[%s1800_s30 + $0x7c8] sm:$0xff]  ;;  %1401 = vst [vmem:[%s1823_s17 + $0x778] sm:$0xff] %v1145_v10 }
 0x104   : > { %v893_v20 = vmul.f32 2.0, %v637_v11  ;;  %v894_v21 = vmul.f32 2.0, %v638_v12  ;;  %v895_v22 = vmul.f32 2.0, %v639_v13  ;;  %v641_v23 = vmax.f32 %v385_v9, 0.0  ;;  %v388_v24 = vld [vmem:[%s1800_s30 + $0x7d0] sm:$0xff]  ;;  %v389_v25 = vld [vmem:[%s1800_s30 + $0x7d8] sm:$0xff] }
 0x105   : > { %v1146_v26 = vadd.f32 0.5, %v890_v14  ;;  %v1147_v27 = vadd.f32 0.5, %v891_v15  ;;  %v1148_v28 = vadd.f32 0.5, %v892_v16  ;;  %v896_v29 = vmul.f32 2.0, %v640_v17  ;;  %v390_v30 = vld [vmem:[%s1800_s30 + $0x7e0] sm:$0xff]  ;;  %v391_v31 = vld [vmem:[%s1800_s30 + $0x7e8] sm:$0xff] }
 0x106   : > { %v1149_v32 = vadd.f32 0.5, %v893_v20  ;;  %v1150_v33 = vadd.f32 0.5, %v894_v21  ;;  %v1151_v34 = vadd.f32 0.5, %v895_v22  ;;  %v897_v35 = vmul.f32 2.0, %v641_v23  ;;  %v392_v36 = vld [vmem:[%s1800_s30 + $0x7f0] sm:$0xff]  ;;  %v393_v41 = vld [vmem:[%s1800_s30 + $0x7f8] sm:$0xff] }
 0x107   : > { %1402 = vst [vmem:[%s1823_s17 + $0x780] sm:$0xff] %v1146_v26  ;;  %1403 = vst [vmem:[%s1823_s17 + $0x788] sm:$0xff] %v1147_v27  ;;  %v1152_v37 = vadd.f32 0.5, %v896_v29  ;;  %v642_v38 = vmax.f32 %v386_v18, 0.0  ;;  %v643_v39 = vmax.f32 %v387_v19, 0.0  ;;  %v644_v40 = vmax.f32 %v388_v24, 0.0 }
 0x108   : > { %1404 = vst [vmem:[%s1823_s17 + $0x790] sm:$0xff] %v1148_v28  ;;  %1405 = vst [vmem:[%s1823_s17 + $0x798] sm:$0xff] %v1149_v32  ;;  %v1153_v42 = vadd.f32 0.5, %v897_v35  ;;  %v645_v43 = vmax.f32 %v389_v25, 0.0  ;;  %v646_v44 = vmax.f32 %v390_v30, 0.0  ;;  %v647_v45 = vmax.f32 %v391_v31, 0.0 }
 0x109   : > { %1406 = vst [vmem:[%s1823_s17 + $0x7a0] sm:$0xff] %v1150_v33  ;;  %1407 = vst [vmem:[%s1823_s17 + $0x7a8] sm:$0xff] %v1151_v34  ;;  %v898_v46 = vmul.f32 2.0, %v642_v38  ;;  %v899_v47 = vmul.f32 2.0, %v643_v39  ;;  %v900_v48 = vmul.f32 2.0, %v644_v40  ;;  %v648_v49 = vmax.f32 %v392_v36, 0.0 }
 0x10a   : > { %1408 = vst [vmem:[%s1823_s17 + $0x7b0] sm:$0xff] %v1152_v37  ;;  %1409 = vst [vmem:[%s1823_s17 + $0x7b8] sm:$0xff] %v1153_v42  ;;  %v901_v50 = vmul.f32 2.0, %v645_v43  ;;  %v902_v51 = vmul.f32 2.0, %v646_v44  ;;  %v903_v52 = vmul.f32 2.0, %v647_v45  ;;  %v649_v53 = vmax.f32 %v393_v41, 0.0 }
 0x10b   : > { %v1154_v54 = vadd.f32 0.5, %v898_v46  ;;  %v1155_v55 = vadd.f32 0.5, %v899_v47  ;;  %v1156_v56 = vadd.f32 0.5, %v900_v48  ;;  %v904_v57 = vmul.f32 2.0, %v648_v49  ;;  %s1419_s2 = scalar_lea.sflag [#allocation4], %s1794_s23  ;;  %s1606_s3 = scalar_lea.vmem %s2324_s27, 32768 }
 0x10c   : > { %v1157_v58 = vadd.f32 0.5, %v901_v50  ;;  %v1158_v59 = vadd.f32 0.5, %v902_v51  ;;  %v1159_v60 = vadd.f32 0.5, %v903_v52  ;;  %v905_v61 = vmul.f32 2.0, %v649_v53  ;;  %p1607_p6 = scmp.ne.s32.totalorder %s2324_s27, %s1606_s3  ;;  %p2381_p11 = scmp.ne.s32.totalorder %s2378_s18, 0 }
 0x10d   : > { %1410 = vst [vmem:[%s1823_s17 + $0x7c0] sm:$0xff] %v1154_v54  ;;  %1411 = vst [vmem:[%s1823_s17 + $0x7c8] sm:$0xff] %v1155_v55  ;;  %v1160_v62 = vadd.f32 0.5, %v904_v57  ;;  %s1677_s4 = smov [#allocation5]  }
 0x10e   : > { %1412 = vst [vmem:[%s1823_s17 + $0x7d0] sm:$0xff] %v1156_v56  ;;  %1413 = vst [vmem:[%s1823_s17 + $0x7d8] sm:$0xff] %v1157_v58  ;;  %v1161_v63 = vadd.f32 0.5, %v905_v61  ;;  %p1608_p12 = pnand %p1607_p6, %p2381_p11  ;;  %s1610_s5 = sshll.u32 %s1677_s4, 4  ;;  %s1611_s5 = int_to_ptr.vmem [resolvable:$false] %s1610_s5 }
 0x10f   : > { %1414 = vst [vmem:[%s1823_s17 + $0x7e0] sm:$0xff] %v1158_v59  ;;  %1415 = vst [vmem:[%s1823_s17 + $0x7e8] sm:$0xff] %v1159_v60  ;;  %s1612_s11 = scalar_lea.vmem %s1611_s5, 65536  ;;  %p1613_p8 = scmp.lt.s32.totalorder %s2324_s27, %s1611_s5 }
 0x110   : > { %1416 = vst [vmem:[%s1823_s17 + $0x7f0] sm:$0xff] %v1160_v62  ;;  %1417 = vst [vmem:[%s1823_s17 + $0x7f8] sm:$0xff] %v1161_v63  ;;  %p1609_p13 = pneg %p1608_p12  ;;  %p1614_p10 = scmp.lt.s32.totalorder %s1612_s11, %s1606_s3 }
 0x112   : > { %p1615_p0 = por %p1614_p10, %p1613_p8 }
 0x114   : > { %p1616_p2 = pnand %p1615_p0, %p1609_p13 }
 0x116   : > { %1619 = shalt.err (!%p1616_p2)
}
 0x117   : > { %s1620_s13 = scalar_lea.hbm %s2322_s29, 32768  ;;  %s1624_s20 = scalar_lea.hbm %s2374_s1, 65536 }
 0x118   : > { %p1621_p4 = scmp.ne.s32.totalorder %s2322_s29, %s1620_s13  ;;  %p1625_p9 = scmp.lt.u32.totalorder %s2322_s29, %s2374_s1 }
 0x119   : > { %p1626_p1 = scmp.lt.u32.totalorder %s1624_s20, %s1620_s13  ;;  %p1628_p6 = scmp.lt.u32.totalorder %s1620_s13, %s2322_s29 }
 0x11a   : > { %p1622_p5 = pnand %p1621_p4, %p2381_p11 }
 0x11b   : > { %p1627_p3 = por %p1626_p1, %p1625_p9 }
 0x11c   : > { %p1623_p7 = pneg %p1622_p5 }
 0x11d   : > { %p1629_p12 = por %p1628_p6, %p1627_p3 }
 0x11f   : > { %p1630_p13 = pnand %p1629_p12, %p1623_p7 }
 0x121   : > { %1633 = shalt.err (!%p1630_p13)
}
 0x122   : > { %s1678_s24 = smov 512   ;;  %s1679_s26 = smov 32  }
 0x123   : > { %1528 = dma.vmem_to_hbm [thread:$0]  (%p2381_p11), %s2324_s27, 32768, %s2322_s29, %s1419_s2, %s1678_s24, %s1678_s24, %s1679_s26  }
 0x124 PF: > { %s1448_s30 = sand.u32 1, %s1660_s6   ;;  %p2382_p8 = scmp.ne.s32.totalorder %s2379_s19, 0 }
 0x125   : > { %p2383_p10 = scmp.ge.s32.totalorder %s1672_s9, 2  ;;  %s1449_s17 = scalar_lea.sflag [#allocation4], %s1448_s30 }
 0x127   : > { %p1535_p0 = pnand %p2383_p10, %p2382_p8 }
 0x129   : > { %1655 = dma.done.wait (!%p1535_p0), %s1449_s17, 32768  }
 0x12a   : > { %1657 = vsyncadd (!%p1535_p0), %s1449_s17, 4294934528  ;;  %p14_p2 = scmp.ge.s32.totalorder %s1715_s12, 4   ;;  %s2384_s6 = smov %s1664_s7 }
 0x12b   : > { %s2385_s7 = smov %s1668_s8  ;;  %s2386_s8 = smov %s1727_s15 }
 0x12c   : > { %s2387_s9 = smov %s1715_s12  ;;  %16 = sbr.rel (!%p14_p2) target bundleno = 5 (0x5), region = 69 }
 0x133   :  { %1454 = vsyncpa [#allocation3], 1 }
 0x134   :  { %1456 = vsyncpa [#allocation3 + $0x1], 1 }
 0x135   :  { %1457 = vsyncpa [#allocation4], 1 }
 0x136   :  { %1459 = vsyncpa [#allocation4 + $0x1], 1 }

</bundles_post_ra>
